<compile_context>
chip_gen: v7x
topology: tpu7x:2x2x1
jax: 0.10.0
libtpu: 0.0.40
codegen_flags: <defaults>
</compile_context>

<pallas_src>
import math
import functools

import jax
import jax.numpy as jnp
from jax.experimental import pallas as pl
from jax.experimental.pallas import tpu as pltpu

B, L, D, H = 2, 8, 32, 4          # batch, seq, d_model, n_heads
E = D // H                        # head dim
DFF = 4 * D                       # d_ff (PyTorch default d_ff = 4 * d_model)
N_LAYERS = 2
EPS = 1e-5                        # nn.LayerNorm default eps


def _layer_norm(x, g, b):
    mu = jnp.mean(x, axis=-1, keepdims=True)
    var = jnp.mean(jnp.square(x - mu), axis=-1, keepdims=True)  # biased, like torch
    return (x - mu) * jax.lax.rsqrt(var + EPS) * g + b


def _num_batch_grid_steps():
    """Split the batch across TensorCores only on v7x (2 TCs/chip)."""
    try:
        kind = jax.devices()[0].device_kind.lower()
    except Exception:
        return 1
    if ('v7' in kind or 'tpu7' in kind) and B % 2 == 0:
        return B                                   # one batch element per grid step
    return 1                                       # v5e / v6e: single block, no loop


# --------------------------------------------------------------------------- #
# Fused encoder kernel: N_LAYERS encoder layers + final LayerNorm, one call.  #
# --------------------------------------------------------------------------- #
def _make_encoder_call(grid_b):
    BB = B // grid_b                               # batch elements per grid step

    def encoder_kernel(x_ref, wqkv_ref, bqkv_ref, bo_ref, g1_ref, be1_ref,
                       w1_ref, bf1_ref, w2_ref, bf2_ref, g2_ref, be2_ref,
                       gf_ref, bff_ref, out_ref, attn_ref):
        x = x_ref[...]                             # (BB*L, D) fp32, stays in VMEM/vregs

        for layer in range(N_LAYERS):              # static unroll over layers
            # Fused Q / K / (V·Wo) projection: bf16 operands, f32 accumulation.
            # wqkv is (D, 2D + H*D); 1/sqrt(E) already folded into the Q columns.
            qkv = (jnp.dot(x.astype(jnp.bfloat16), wqkv_ref[layer],
                           preferred_element_type=jnp.float32)
                   + bqkv_ref[layer])              # (BB*L, 2D + H*D) fp32

            acc = jnp.zeros((BB * L, D), jnp.float32)
            ps = []
            for h in range(H):                     # static unroll over heads
                qh = qkv[:, h * E:(h + 1) * E].reshape(BB, L, E).astype(jnp.bfloat16)
                kh = qkv[:, D + h * E:D + (h + 1) * E].reshape(BB, L, E).astype(jnp.bfloat16)
                # W_o is host-fused into v', so v' is already D wide (model dim)
                vh = qkv[:, 2 * D + h * D:2 * D + (h + 1) * D].reshape(BB, L, D).astype(jnp.bfloat16)

                s = jnp.einsum('ble,bme->blm', qh, kh,
                               preferred_element_type=jnp.float32)       # (BB, L, L)
                s = s - jnp.max(s, axis=-1, keepdims=True)
                p = jnp.exp(s)
                # EUP approx reciprocal: rows sum to ~1 (within 5e-3 tolerance)
                p = p * pl.reciprocal(jnp.sum(p, axis=-1, keepdims=True), approx=True)
                ps.append(p)
                acc = acc + jnp.einsum('blm,bmd->bld',
                                       p.astype(jnp.bfloat16), vh,
                                       preferred_element_type=jnp.float32
                                       ).reshape(BB * L, D)

            # one batched attention-map store per layer (instead of H tiny stores)
            attn_ref[layer] = jnp.stack(ps, axis=1)                      # (BB, H, L, L)

            x = _layer_norm(x + acc + bo_ref[layer], g1_ref[layer], be1_ref[layer])

            # position-wise FFN: Conv1d(k=1) -> relu -> Conv1d(k=1)
            y = (jnp.dot(x.astype(jnp.bfloat16), w1_ref[layer],
                         preferred_element_type=jnp.float32) + bf1_ref[layer])
            y = jnp.maximum(y, 0.0)
            y = (jnp.dot(y.astype(jnp.bfloat16), w2_ref[layer],
                         preferred_element_type=jnp.float32) + bf2_ref[layer])
            x = _layer_norm(x + y, g2_ref[layer], be2_ref[layer])

        x = _layer_norm(x, gf_ref[...], bff_ref[...])   # Encoder's final norm
        out_ref[...] = x.astype(out_ref.dtype)          # contiguous (BB*L, D) store

    def _rep_spec(shape):
        n = len(shape)
        return pl.BlockSpec(shape, lambda i, _n=n: (0,) * _n)   # replicated weights

    x_spec = pl.BlockSpec((BB * L, D), lambda i: (i, 0))
    out_spec = pl.BlockSpec((BB * L, D), lambda i: (i, 0))
    attn_spec = pl.BlockSpec((N_LAYERS, BB, H, L, L), lambda i: (0, i, 0, 0, 0))

    def call(x2, packed):
        in_specs = [x_spec] + [_rep_spec(a.shape) for a in packed]
        out_shapes = (jax.ShapeDtypeStruct((B * L, D), jnp.float32),
                      jax.ShapeDtypeStruct((N_LAYERS, B, H, L, L), jnp.float32))
        return pl.pallas_call(
            encoder_kernel,
            out_shape=out_shapes,
            grid_spec=pltpu.PrefetchScalarGridSpec(
                num_scalar_prefetch=0, grid=(grid_b,),
                in_specs=in_specs,
                out_specs=[out_spec, attn_spec]),
            compiler_params=pltpu.CompilerParams(
                dimension_semantics=(("parallel",) if grid_b > 1
                                     else ("arbitrary",))),
        )(x2, *packed)

    return call


@functools.lru_cache(maxsize=None)
def _get_encoder_call():
    return _make_encoder_call(_num_batch_grid_steps())


@jax.jit
def encoder_forward(x, packed):
    """x: (B, L, D); packed: stacked / pre-transposed / bf16 weights (pack_params)."""
    x2 = x.reshape(B * L, D)                        # wrapper-side layout plumbing (free)
    out2, attn_all = _get_encoder_call()(x2, packed)
    out = out2.reshape(B, L, D)
    attns = [attn_all[i] for i in range(N_LAYERS)]  # already (B, H, L, L) per layer
    return out, attns


# --------------------------------------------------------------------------- #
# Parameter construction (PyTorch layout) + host-side packing for the kernel. #
# --------------------------------------------------------------------------- #
def make_layer_params(key):
    ks = jax.random.split(key, 8)
    sd = 0.05
    return dict(
        wq=jax.random.normal(ks[0], (D, D), jnp.float32) * sd,
        wk=jax.random.normal(ks[1], (D, D), jnp.float32) * sd,
        wv=jax.random.normal(ks[2], (D, D), jnp.float32) * sd,
        wo=jax.random.normal(ks[3], (D, D), jnp.float32) * sd,
        bq=jax.random.normal(ks[4], (D,), jnp.float32) * sd,
        bk=jax.random.normal(ks[5], (D,), jnp.float32) * sd,
        bv=jnp.zeros((D,), jnp.float32),
        bo=jnp.zeros((D,), jnp.float32),
        g1=jnp.ones((D,), jnp.float32), be1=jnp.zeros((D,), jnp.float32),
        w1=jax.random.normal(ks[6], (DFF, D), jnp.float32) * sd,   # Conv1d weight[:, :, 0]
        b1=jnp.zeros((DFF,), jnp.float32),
        w2=jax.random.normal(ks[7], (D, DFF), jnp.float32) * sd,   # Conv1d weight[:, :, 0]
        b2=jnp.zeros((D,), jnp.float32),
        g2=jnp.ones((D,), jnp.float32), be2=jnp.zeros((D,), jnp.float32),
    )


def pack_params(layer_params, norm_gamma, norm_beta):
    """Host-side plumbing: transpose to x@W layout, fold 1/sqrt(E) into Q,
    fuse W_o into each head's W_v, fuse QKV', stack layers, cast matmul
    weights to bf16 (f32 accumulation in-kernel)."""
    scale = 1.0 / math.sqrt(E)
    mm_dtype = jnp.bfloat16

    def fuse_layer(p):
        wq_t = p['wq'].T * scale                               # fold softmax scale
        wk_t = p['wk'].T
        wv_t = p['wv'].T
        wo_t = p['wo'].T
        # W_o host-fused into per-head W_v (mathematically exact)
        wv_fused = jnp.concatenate(
            [wv_t[:, h * E:(h + 1) * E] @ wo_t[h * E:(h + 1) * E, :]
             for h in range(H)], axis=1)                       # (D, H*D)
        bv_fused = jnp.concatenate(
            [p['bv'][h * E:(h + 1) * E] @ wo_t[h * E:(h + 1) * E, :]
             for h in range(H)], axis=0)                       # (H*D,)
        wqkv = jnp.concatenate([wq_t, wk_t, wv_fused], axis=1)  # (D, 2D + H*D)
        bqkv = jnp.concatenate([p['bq'] * scale, p['bk'], bv_fused])
        return wqkv, bqkv

    fused = [fuse_layer(p) for p in layer_params]

    def stack(fn):
        return jnp.stack([fn(p) for p in layer_params], axis=0)

    wqkv = jnp.stack([f[0] for f in fused], axis=0).astype(mm_dtype)   # (NL, D, 2D+H*D)
    bqkv = jnp.stack([f[1][None, :] for f in fused], axis=0)           # (NL, 1, 2D+H*D)
    bo = stack(lambda p: p['bo'][None, :])
    g1 = stack(lambda p: p['g1'][None, :]); be1 = stack(lambda p: p['be1'][None, :])
    w1_t = stack(lambda p: p['w1'].T).astype(mm_dtype)                 # (NL, D, DFF)
    b1 = stack(lambda p: p['b1'][None, :])
    w2_t = stack(lambda p: p['w2'].T).astype(mm_dtype)                 # (NL, DFF, D)
    b2 = stack(lambda p: p['b2'][None, :])
    g2 = stack(lambda p: p['g2'][None, :]); be2 = stack(lambda p: p['be2'][None, :])
    gf = norm_gamma[None, :]; bf = norm_beta[None, :]
    return (wqkv, bqkv, bo, g1, be1, w1_t, b1, w2_t, b2, g2, be2, gf, bf)


# --------------------------------------------------------------------------- #
# Pure-JAX reference (PyTorch semantics, fp32) for correctness checking.      #
# --------------------------------------------------------------------------- #
def encoder_reference(x, layer_params, norm_gamma, norm_beta):
    def layer_ref(x, p):
        q = (x @ p['wq'].T + p['bq']).reshape(B, L, H, E)
        k = (x @ p['wk'].T + p['bk']).reshape(B, L, H, E)
        v = (x @ p['wv'].T + p['bv']).reshape(B, L, H, E)
        s = jnp.einsum('blhe,bmhe->bhlm', q, k) / math.sqrt(E)
        a = jax.nn.softmax(s, axis=-1)                                  # (B, H, L, L)
        ctx = jnp.einsum('bhlm,bmhe->blhe', a, v).reshape(B, L, D)
        x = _layer_norm(x + ctx @ p['wo'].T + p['bo'], p['g1'], p['be1'])
        y = jnp.maximum(x @ p['w1'].T + p['b1'], 0.0)
        y = y @ p['w2'].T + p['b2']
        return _layer_norm(x + y, p['g2'], p['be2']), a

    attns = []
    for p in layer_params:
        x, a = layer_ref(x, p)
        attns.append(a)
    return _layer_norm(x, norm_gamma, norm_beta), attns


if __name__ == "__main__":
    key = jax.random.PRNGKey(0)
    kx, kp = jax.random.split(key)
    x = jax.random.normal(kx, (B, L, D), dtype=jnp.float32)
    layer_params = [make_layer_params(jax.random.fold_in(kp, i)) for i in range(N_LAYERS)]
    norm_gamma = jnp.ones((D,), jnp.float32)
    norm_beta = jnp.zeros((D,), jnp.float32)

    packed = pack_params(layer_params, norm_gamma, norm_beta)
    out, attns = encoder_forward(x, packed)
    jax.block_until_ready(out)
    for a in attns:
        jax.block_until_ready(a)

    assert out.shape == (B, L, D) and len(attns) == N_LAYERS
    assert all(a.shape == (B, H, L, L) for a in attns)

    ref_out, ref_attns = encoder_reference(x, layer_params, norm_gamma, norm_beta)
    # bf16 matmul operands (f32 accumulation) + approx softmax reciprocal:
    # errors stay well inside the 5e-3 tolerance at this scale.
    assert bool(jnp.allclose(out, ref_out, atol=5e-3, rtol=5e-3))
    for a, ra in zip(attns, ref_attns):
        assert bool(jnp.allclose(a, ra, atol=5e-3, rtol=5e-3))

    print("KERNEL_OK")
</pallas_src>

<mosaic_0001>
module attributes {stable_mosaic.version = 11 : i64} {
  func.func @encoder_kernel(%arg0: i32, %arg1: memref<16x32xf32, #tpu.memory_space<vmem>>, %arg2: memref<2x32x192xbf16, #tpu.memory_space<vmem>>, %arg3: memref<2x1x192xf32, #tpu.memory_space<vmem>>, %arg4: memref<2x1x32xf32, #tpu.memory_space<vmem>>, %arg5: memref<2x1x32xf32, #tpu.memory_space<vmem>>, %arg6: memref<2x1x32xf32, #tpu.memory_space<vmem>>, %arg7: memref<2x32x128xbf16, #tpu.memory_space<vmem>>, %arg8: memref<2x1x128xf32, #tpu.memory_space<vmem>>, %arg9: memref<2x128x32xbf16, #tpu.memory_space<vmem>>, %arg10: memref<2x1x32xf32, #tpu.memory_space<vmem>>, %arg11: memref<2x1x32xf32, #tpu.memory_space<vmem>>, %arg12: memref<2x1x32xf32, #tpu.memory_space<vmem>>, %arg13: memref<1x32xf32, #tpu.memory_space<vmem>>, %arg14: memref<1x32xf32, #tpu.memory_space<vmem>>, %arg15: memref<16x32xf32, #tpu.memory_space<vmem>>, %arg16: memref<2x2x4x8x8xf32, #tpu.memory_space<vmem>>) attributes {dimension_semantics = [#tpu.dimension_semantics<arbitrary>], iteration_bounds = array<i64: 1>, scalar_prefetch = 0 : i64, scratch_operands = 0 : i64, tpu.core_type = #tpu.core_type<tc>, window_params = [{transform_indices = @transform_0, window_bounds = array<i64: 16, 32>}, {pipeline_mode = #tpu.pipeline_mode<synchronous>, transform_indices = @transform_1, window_bounds = array<i64: 2, 32, 192>}, {pipeline_mode = #tpu.pipeline_mode<synchronous>, transform_indices = @transform_2, window_bounds = array<i64: 2, 1, 192>}, {pipeline_mode = #tpu.pipeline_mode<synchronous>, transform_indices = @transform_3, window_bounds = array<i64: 2, 1, 32>}, {pipeline_mode = #tpu.pipeline_mode<synchronous>, transform_indices = @transform_4, window_bounds = array<i64: 2, 1, 32>}, {pipeline_mode = #tpu.pipeline_mode<synchronous>, transform_indices = @transform_5, window_bounds = array<i64: 2, 1, 32>}, {pipeline_mode = #tpu.pipeline_mode<synchronous>, transform_indices = @transform_6, window_bounds = array<i64: 2, 32, 128>}, {pipeline_mode = #tpu.pipeline_mode<synchronous>, transform_indices = @transform_7, window_bounds = array<i64: 2, 1, 128>}, {pipeline_mode = #tpu.pipeline_mode<synchronous>, transform_indices = @transform_8, window_bounds = array<i64: 2, 128, 32>}, {pipeline_mode = #tpu.pipeline_mode<synchronous>, transform_indices = @transform_9, window_bounds = array<i64: 2, 1, 32>}, {pipeline_mode = #tpu.pipeline_mode<synchronous>, transform_indices = @transform_10, window_bounds = array<i64: 2, 1, 32>}, {pipeline_mode = #tpu.pipeline_mode<synchronous>, transform_indices = @transform_11, window_bounds = array<i64: 2, 1, 32>}, {pipeline_mode = #tpu.pipeline_mode<synchronous>, transform_indices = @transform_12, window_bounds = array<i64: 1, 32>}, {pipeline_mode = #tpu.pipeline_mode<synchronous>, transform_indices = @transform_13, window_bounds = array<i64: 1, 32>}, {transform_indices = @transform_14, window_bounds = array<i64: 16, 32>}, {transform_indices = @transform_15, window_bounds = array<i64: 2, 2, 4, 8, 8>}]} {
    %c0 = arith.constant 0 : index
    %c0_0 = arith.constant 0 : index
    %0 = vector.load %arg1[%c0, %c0_0] : memref<16x32xf32, #tpu.memory_space<vmem>>, vector<16x32xf32>
    %1 = arith.truncf %0 : vector<16x32xf32> to vector<16x32xbf16>
    %c0_1 = arith.constant 0 : index
    %c0_2 = arith.constant 0 : index
    %c0_3 = arith.constant 0 : index
    %2 = vector.load %arg2[%c0_1, %c0_2, %c0_3] : memref<2x32x192xbf16, #tpu.memory_space<vmem>>, vector<1x32x192xbf16>
    %3 = vector.shape_cast %2 : vector<1x32x192xbf16> to vector<32x192xbf16>
    %cst = arith.constant dense<0.000000e+00> : vector<16x192xf32>
    %4 = tpu.matmul %1, %3, %cst {dimension_numbers = #tpu.dot_dimension_numbers<[1], [0], [0], [1], [0, 0, 1, 1], [], []>} : vector<16x32xbf16>, vector<32x192xbf16>, vector<16x192xf32> -> vector<16x192xf32>
    %c0_4 = arith.constant 0 : index
    %c0_5 = arith.constant 0 : index
    %c0_6 = arith.constant 0 : index
    %5 = vector.load %arg3[%c0_4, %c0_5, %c0_6] : memref<2x1x192xf32, #tpu.memory_space<vmem>>, vector<1x1x192xf32>
    %6 = vector.shape_cast %5 : vector<1x1x192xf32> to vector<1x192xf32>
    %7 = vector.broadcast %6 : vector<1x192xf32> to vector<16x192xf32>
    %8 = arith.addf %4, %7 : vector<16x192xf32>
    %cst_7 = arith.constant 0.000000e+00 : f32
    %9 = vector.broadcast %cst_7 : f32 to vector<16x32xf32>
    %10 = vector.extract_strided_slice %8 {offsets = [0, 0], sizes = [16, 8], strides = [1, 1]} : vector<16x192xf32> to vector<16x8xf32>
    %11 = vector.shape_cast %10 : vector<16x8xf32> to vector<2x8x8xf32>
    %12 = arith.truncf %11 : vector<2x8x8xf32> to vector<2x8x8xbf16>
    %13 = vector.extract_strided_slice %8 {offsets = [0, 32], sizes = [16, 8], strides = [1, 1]} : vector<16x192xf32> to vector<16x8xf32>
    %14 = vector.shape_cast %13 : vector<16x8xf32> to vector<2x8x8xf32>
    %15 = arith.truncf %14 : vector<2x8x8xf32> to vector<2x8x8xbf16>
    %16 = vector.extract_strided_slice %8 {offsets = [0, 64], sizes = [16, 32], strides = [1, 1]} : vector<16x192xf32> to vector<16x32xf32>
    %17 = vector.shape_cast %16 : vector<16x32xf32> to vector<2x8x32xf32>
    %18 = arith.truncf %17 : vector<2x8x32xf32> to vector<2x8x32xbf16>
    "tpu.trace_start"() <{level = 10 : i32, message = "ble,bme->blm"}> : () -> ()
    %cst_8 = arith.constant dense<0.000000e+00> : vector<2x8x8xf32>
    %19 = tpu.matmul %12, %15, %cst_8 {dimension_numbers = #tpu.dot_dimension_numbers<[2], [2], [1], [1], [0, 0, 0, 1, 1, 1], [0], [0]>} : vector<2x8x8xbf16>, vector<2x8x8xbf16>, vector<2x8x8xf32> -> vector<2x8x8xf32>
    "tpu.trace_stop"() : () -> ()
    %cst_9 = arith.constant dense<0xFF800000> : vector<2x8xf32>
    %20 = vector.multi_reduction <maximumf>, %19, %cst_9 [2] : vector<2x8x8xf32> to vector<2x8xf32>
    %21 = vector.shape_cast %20 : vector<2x8xf32> to vector<2x8x1xf32>
    %22 = vector.broadcast %21 : vector<2x8x1xf32> to vector<2x8x8xf32>
    %23 = arith.subf %19, %22 : vector<2x8x8xf32>
    %24 = math.exp %23 : vector<2x8x8xf32>
    %cst_10 = arith.constant dense<0.000000e+00> : vector<2x8xf32>
    %25 = vector.multi_reduction <add>, %24, %cst_10 [2] : vector<2x8x8xf32> to vector<2x8xf32>
    %26 = vector.shape_cast %25 : vector<2x8xf32> to vector<2x8x1xf32>
    %27 = tpu.reciprocal %26 {approx = true} : vector<2x8x1xf32> -> vector<2x8x1xf32>
    %28 = vector.broadcast %27 : vector<2x8x1xf32> to vector<2x8x8xf32>
    %29 = arith.mulf %24, %28 : vector<2x8x8xf32>
    %30 = arith.truncf %29 : vector<2x8x8xf32> to vector<2x8x8xbf16>
    "tpu.trace_start"() <{level = 10 : i32, message = "blm,bmd->bld"}> : () -> ()
    %cst_11 = arith.constant dense<0.000000e+00> : vector<2x8x32xf32>
    %31 = tpu.matmul %30, %18, %cst_11 {dimension_numbers = #tpu.dot_dimension_numbers<[2], [1], [1], [2], [0, 0, 0, 1, 1, 2], [0], [0]>} : vector<2x8x8xbf16>, vector<2x8x32xbf16>, vector<2x8x32xf32> -> vector<2x8x32xf32>
    "tpu.trace_stop"() : () -> ()
    %32 = vector.shape_cast %31 : vector<2x8x32xf32> to vector<16x32xf32>
    %33 = arith.addf %9, %32 : vector<16x32xf32>
    %34 = vector.extract_strided_slice %8 {offsets = [0, 8], sizes = [16, 8], strides = [1, 1]} : vector<16x192xf32> to vector<16x8xf32>
    %35 = vector.shape_cast %34 : vector<16x8xf32> to vector<2x8x8xf32>
    %36 = arith.truncf %35 : vector<2x8x8xf32> to vector<2x8x8xbf16>
    %37 = vector.extract_strided_slice %8 {offsets = [0, 40], sizes = [16, 8], strides = [1, 1]} : vector<16x192xf32> to vector<16x8xf32>
    %38 = vector.shape_cast %37 : vector<16x8xf32> to vector<2x8x8xf32>
    %39 = arith.truncf %38 : vector<2x8x8xf32> to vector<2x8x8xbf16>
    %40 = vector.extract_strided_slice %8 {offsets = [0, 96], sizes = [16, 32], strides = [1, 1]} : vector<16x192xf32> to vector<16x32xf32>
    %41 = vector.shape_cast %40 : vector<16x32xf32> to vector<2x8x32xf32>
    %42 = arith.truncf %41 : vector<2x8x32xf32> to vector<2x8x32xbf16>
    "tpu.trace_start"() <{level = 10 : i32, message = "ble,bme->blm"}> : () -> ()
    %cst_12 = arith.constant dense<0.000000e+00> : vector<2x8x8xf32>
    %43 = tpu.matmul %36, %39, %cst_12 {dimension_numbers = #tpu.dot_dimension_numbers<[2], [2], [1], [1], [0, 0, 0, 1, 1, 1], [0], [0]>} : vector<2x8x8xbf16>, vector<2x8x8xbf16>, vector<2x8x8xf32> -> vector<2x8x8xf32>
    "tpu.trace_stop"() : () -> ()
    %cst_13 = arith.constant dense<0xFF800000> : vector<2x8xf32>
    %44 = vector.multi_reduction <maximumf>, %43, %cst_13 [2] : vector<2x8x8xf32> to vector<2x8xf32>
    %45 = vector.shape_cast %44 : vector<2x8xf32> to vector<2x8x1xf32>
    %46 = vector.broadcast %45 : vector<2x8x1xf32> to vector<2x8x8xf32>
    %47 = arith.subf %43, %46 : vector<2x8x8xf32>
    %48 = math.exp %47 : vector<2x8x8xf32>
    %cst_14 = arith.constant dense<0.000000e+00> : vector<2x8xf32>
    %49 = vector.multi_reduction <add>, %48, %cst_14 [2] : vector<2x8x8xf32> to vector<2x8xf32>
    %50 = vector.shape_cast %49 : vector<2x8xf32> to vector<2x8x1xf32>
    %51 = tpu.reciprocal %50 {approx = true} : vector<2x8x1xf32> -> vector<2x8x1xf32>
    %52 = vector.broadcast %51 : vector<2x8x1xf32> to vector<2x8x8xf32>
    %53 = arith.mulf %48, %52 : vector<2x8x8xf32>
    %54 = arith.truncf %53 : vector<2x8x8xf32> to vector<2x8x8xbf16>
    "tpu.trace_start"() <{level = 10 : i32, message = "blm,bmd->bld"}> : () -> ()
    %cst_15 = arith.constant dense<0.000000e+00> : vector<2x8x32xf32>
    %55 = tpu.matmul %54, %42, %cst_15 {dimension_numbers = #tpu.dot_dimension_numbers<[2], [1], [1], [2], [0, 0, 0, 1, 1, 2], [0], [0]>} : vector<2x8x8xbf16>, vector<2x8x32xbf16>, vector<2x8x32xf32> -> vector<2x8x32xf32>
    "tpu.trace_stop"() : () -> ()
    %56 = vector.shape_cast %55 : vector<2x8x32xf32> to vector<16x32xf32>
    %57 = arith.addf %33, %56 : vector<16x32xf32>
    %58 = vector.extract_strided_slice %8 {offsets = [0, 16], sizes = [16, 8], strides = [1, 1]} : vector<16x192xf32> to vector<16x8xf32>
    %59 = vector.shape_cast %58 : vector<16x8xf32> to vector<2x8x8xf32>
    %60 = arith.truncf %59 : vector<2x8x8xf32> to vector<2x8x8xbf16>
    %61 = vector.extract_strided_slice %8 {offsets = [0, 48], sizes = [16, 8], strides = [1, 1]} : vector<16x192xf32> to vector<16x8xf32>
    %62 = vector.shape_cast %61 : vector<16x8xf32> to vector<2x8x8xf32>
    %63 = arith.truncf %62 : vector<2x8x8xf32> to vector<2x8x8xbf16>
    %64 = vector.extract_strided_slice %8 {offsets = [0, 128], sizes = [16, 32], strides = [1, 1]} : vector<16x192xf32> to vector<16x32xf32>
    %65 = vector.shape_cast %64 : vector<16x32xf32> to vector<2x8x32xf32>
    %66 = arith.truncf %65 : vector<2x8x32xf32> to vector<2x8x32xbf16>
    "tpu.trace_start"() <{level = 10 : i32, message = "ble,bme->blm"}> : () -> ()
    %cst_16 = arith.constant dense<0.000000e+00> : vector<2x8x8xf32>
    %67 = tpu.matmul %60, %63, %cst_16 {dimension_numbers = #tpu.dot_dimension_numbers<[2], [2], [1], [1], [0, 0, 0, 1, 1, 1], [0], [0]>} : vector<2x8x8xbf16>, vector<2x8x8xbf16>, vector<2x8x8xf32> -> vector<2x8x8xf32>
    "tpu.trace_stop"() : () -> ()
    %cst_17 = arith.constant dense<0xFF800000> : vector<2x8xf32>
    %68 = vector.multi_reduction <maximumf>, %67, %cst_17 [2] : vector<2x8x8xf32> to vector<2x8xf32>
    %69 = vector.shape_cast %68 : vector<2x8xf32> to vector<2x8x1xf32>
    %70 = vector.broadcast %69 : vector<2x8x1xf32> to vector<2x8x8xf32>
    %71 = arith.subf %67, %70 : vector<2x8x8xf32>
    %72 = math.exp %71 : vector<2x8x8xf32>
    %cst_18 = arith.constant dense<0.000000e+00> : vector<2x8xf32>
    %73 = vector.multi_reduction <add>, %72, %cst_18 [2] : vector<2x8x8xf32> to vector<2x8xf32>
    %74 = vector.shape_cast %73 : vector<2x8xf32> to vector<2x8x1xf32>
    %75 = tpu.reciprocal %74 {approx = true} : vector<2x8x1xf32> -> vector<2x8x1xf32>
    %76 = vector.broadcast %75 : vector<2x8x1xf32> to vector<2x8x8xf32>
    %77 = arith.mulf %72, %76 : vector<2x8x8xf32>
    %78 = arith.truncf %77 : vector<2x8x8xf32> to vector<2x8x8xbf16>
    "tpu.trace_start"() <{level = 10 : i32, message = "blm,bmd->bld"}> : () -> ()
    %cst_19 = arith.constant dense<0.000000e+00> : vector<2x8x32xf32>
    %79 = tpu.matmul %78, %66, %cst_19 {dimension_numbers = #tpu.dot_dimension_numbers<[2], [1], [1], [2], [0, 0, 0, 1, 1, 2], [0], [0]>} : vector<2x8x8xbf16>, vector<2x8x32xbf16>, vector<2x8x32xf32> -> vector<2x8x32xf32>
    "tpu.trace_stop"() : () -> ()
    %80 = vector.shape_cast %79 : vector<2x8x32xf32> to vector<16x32xf32>
    %81 = arith.addf %57, %80 : vector<16x32xf32>
    %82 = vector.extract_strided_slice %8 {offsets = [0, 24], sizes = [16, 8], strides = [1, 1]} : vector<16x192xf32> to vector<16x8xf32>
    %83 = vector.shape_cast %82 : vector<16x8xf32> to vector<2x8x8xf32>
    %84 = arith.truncf %83 : vector<2x8x8xf32> to vector<2x8x8xbf16>
    %85 = vector.extract_strided_slice %8 {offsets = [0, 56], sizes = [16, 8], strides = [1, 1]} : vector<16x192xf32> to vector<16x8xf32>
    %86 = vector.shape_cast %85 : vector<16x8xf32> to vector<2x8x8xf32>
    %87 = arith.truncf %86 : vector<2x8x8xf32> to vector<2x8x8xbf16>
    %88 = vector.extract_strided_slice %8 {offsets = [0, 160], sizes = [16, 32], strides = [1, 1]} : vector<16x192xf32> to vector<16x32xf32>
    %89 = vector.shape_cast %88 : vector<16x32xf32> to vector<2x8x32xf32>
    %90 = arith.truncf %89 : vector<2x8x32xf32> to vector<2x8x32xbf16>
    "tpu.trace_start"() <{level = 10 : i32, message = "ble,bme->blm"}> : () -> ()
    %cst_20 = arith.constant dense<0.000000e+00> : vector<2x8x8xf32>
    %91 = tpu.matmul %84, %87, %cst_20 {dimension_numbers = #tpu.dot_dimension_numbers<[2], [2], [1], [1], [0, 0, 0, 1, 1, 1], [0], [0]>} : vector<2x8x8xbf16>, vector<2x8x8xbf16>, vector<2x8x8xf32> -> vector<2x8x8xf32>
    "tpu.trace_stop"() : () -> ()
    %cst_21 = arith.constant dense<0xFF800000> : vector<2x8xf32>
    %92 = vector.multi_reduction <maximumf>, %91, %cst_21 [2] : vector<2x8x8xf32> to vector<2x8xf32>
    %93 = vector.shape_cast %92 : vector<2x8xf32> to vector<2x8x1xf32>
    %94 = vector.broadcast %93 : vector<2x8x1xf32> to vector<2x8x8xf32>
    %95 = arith.subf %91, %94 : vector<2x8x8xf32>
    %96 = math.exp %95 : vector<2x8x8xf32>
    %cst_22 = arith.constant dense<0.000000e+00> : vector<2x8xf32>
    %97 = vector.multi_reduction <add>, %96, %cst_22 [2] : vector<2x8x8xf32> to vector<2x8xf32>
    %98 = vector.shape_cast %97 : vector<2x8xf32> to vector<2x8x1xf32>
    %99 = tpu.reciprocal %98 {approx = true} : vector<2x8x1xf32> -> vector<2x8x1xf32>
    %100 = vector.broadcast %99 : vector<2x8x1xf32> to vector<2x8x8xf32>
    %101 = arith.mulf %96, %100 : vector<2x8x8xf32>
    %102 = arith.truncf %101 : vector<2x8x8xf32> to vector<2x8x8xbf16>
    "tpu.trace_start"() <{level = 10 : i32, message = "blm,bmd->bld"}> : () -> ()
    %cst_23 = arith.constant dense<0.000000e+00> : vector<2x8x32xf32>
    %103 = tpu.matmul %102, %90, %cst_23 {dimension_numbers = #tpu.dot_dimension_numbers<[2], [1], [1], [2], [0, 0, 0, 1, 1, 2], [0], [0]>} : vector<2x8x8xbf16>, vector<2x8x32xbf16>, vector<2x8x32xf32> -> vector<2x8x32xf32>
    "tpu.trace_stop"() : () -> ()
    %104 = vector.shape_cast %103 : vector<2x8x32xf32> to vector<16x32xf32>
    %105 = arith.addf %81, %104 : vector<16x32xf32>
    %106 = vector.shape_cast %29 : vector<2x8x8xf32> to vector<2x1x8x8xf32>
    %107 = vector.shape_cast %53 : vector<2x8x8xf32> to vector<2x1x8x8xf32>
    %108 = vector.shape_cast %77 : vector<2x8x8xf32> to vector<2x1x8x8xf32>
    %109 = vector.shape_cast %101 : vector<2x8x8xf32> to vector<2x1x8x8xf32>
    %110 = tpu.concatenate %106, %107, %108, %109 in 1 : vector<2x1x8x8xf32>, vector<2x1x8x8xf32>, vector<2x1x8x8xf32>, vector<2x1x8x8xf32> -> vector<2x4x8x8xf32>
    %c0_24 = arith.constant 0 : index
    %c0_25 = arith.constant 0 : index
    %c0_26 = arith.constant 0 : index
    %c0_27 = arith.constant 0 : index
    %c0_28 = arith.constant 0 : index
    %111 = vector.load %arg16[%c0_24, %c0_25, %c0_26, %c0_27, %c0_28] : memref<2x2x4x8x8xf32, #tpu.memory_space<vmem>>, vector<1x2x4x8x8xf32>
    %112 = vector.shape_cast %111 : vector<1x2x4x8x8xf32> to vector<2x4x8x8xf32>
    %113 = vector.shape_cast %110 : vector<2x4x8x8xf32> to vector<1x2x4x8x8xf32>
    tpu.vector_store %arg16[%c0_24, %c0_25, %c0_26, %c0_27, %c0_28], %113 {strides = array<i32>} : memref<2x2x4x8x8xf32, #tpu.memory_space<vmem>>, vector<1x2x4x8x8xf32>,
    %114 = arith.addf %0, %105 : vector<16x32xf32>
    %c0_29 = arith.constant 0 : index
    %c0_30 = arith.constant 0 : index
    %c0_31 = arith.constant 0 : index
    %115 = vector.load %arg4[%c0_29, %c0_30, %c0_31] : memref<2x1x32xf32, #tpu.memory_space<vmem>>, vector<1x1x32xf32>
    %116 = vector.shape_cast %115 : vector<1x1x32xf32> to vector<1x32xf32>
    %117 = vector.broadcast %116 : vector<1x32xf32> to vector<16x32xf32>
    %118 = arith.addf %114, %117 : vector<16x32xf32>
    %c0_32 = arith.constant 0 : index
    %c0_33 = arith.constant 0 : index
    %c0_34 = arith.constant 0 : index
    %119 = vector.load %arg5[%c0_32, %c0_33, %c0_34] : memref<2x1x32xf32, #tpu.memory_space<vmem>>, vector<1x1x32xf32>
    %120 = vector.shape_cast %119 : vector<1x1x32xf32> to vector<1x32xf32>
    %c0_35 = arith.constant 0 : index
    %c0_36 = arith.constant 0 : index
    %c0_37 = arith.constant 0 : index
    %121 = vector.load %arg6[%c0_35, %c0_36, %c0_37] : memref<2x1x32xf32, #tpu.memory_space<vmem>>, vector<1x1x32xf32>
    %122 = vector.shape_cast %121 : vector<1x1x32xf32> to vector<1x32xf32>
    %cst_38 = arith.constant dense<0.000000e+00> : vector<16xf32>
    %123 = vector.multi_reduction <add>, %118, %cst_38 [1] : vector<16x32xf32> to vector<16xf32>
    %124 = vector.shape_cast %123 : vector<16xf32> to vector<16x1xf32>
    %cst_39 = arith.constant 3.200000e+01 : f32
    %125 = vector.broadcast %cst_39 : f32 to vector<16x1xf32>
    %126 = arith.divf %124, %125 : vector<16x1xf32>
    %127 = vector.broadcast %126 : vector<16x1xf32> to vector<16x32xf32>
    %128 = arith.subf %118, %127 : vector<16x32xf32>
    %129 = arith.mulf %128, %128 : vector<16x32xf32>
    %cst_40 = arith.constant dense<0.000000e+00> : vector<16xf32>
    %130 = vector.multi_reduction <add>, %129, %cst_40 [1] : vector<16x32xf32> to vector<16xf32>
    %131 = vector.shape_cast %130 : vector<16xf32> to vector<16x1xf32>
    %cst_41 = arith.constant 3.200000e+01 : f32
    %132 = vector.broadcast %cst_41 : f32 to vector<16x1xf32>
    %133 = arith.divf %131, %132 : vector<16x1xf32>
    %134 = vector.broadcast %126 : vector<16x1xf32> to vector<16x32xf32>
    %135 = arith.subf %118, %134 : vector<16x32xf32>
    %cst_42 = arith.constant 9.99999974E-6 : f32
    %136 = vector.broadcast %cst_42 : f32 to vector<16x1xf32>
    %137 = arith.addf %133, %136 : vector<16x1xf32>
    %138 = math.rsqrt %137 : vector<16x1xf32>
    %139 = vector.broadcast %138 : vector<16x1xf32> to vector<16x32xf32>
    %140 = arith.mulf %135, %139 : vector<16x32xf32>
    %141 = vector.broadcast %120 : vector<1x32xf32> to vector<16x32xf32>
    %142 = arith.mulf %140, %141 : vector<16x32xf32>
    %143 = vector.broadcast %122 : vector<1x32xf32> to vector<16x32xf32>
    %144 = arith.addf %142, %143 : vector<16x32xf32>
    %145 = arith.truncf %144 : vector<16x32xf32> to vector<16x32xbf16>
    %c0_43 = arith.constant 0 : index
    %c0_44 = arith.constant 0 : index
    %c0_45 = arith.constant 0 : index
    %146 = vector.load %arg7[%c0_43, %c0_44, %c0_45] : memref<2x32x128xbf16, #tpu.memory_space<vmem>>, vector<1x32x128xbf16>
    %147 = vector.shape_cast %146 : vector<1x32x128xbf16> to vector<32x128xbf16>
    %cst_46 = arith.constant dense<0.000000e+00> : vector<16x128xf32>
    %148 = tpu.matmul %145, %147, %cst_46 {dimension_numbers = #tpu.dot_dimension_numbers<[1], [0], [0], [1], [0, 0, 1, 1], [], []>} : vector<16x32xbf16>, vector<32x128xbf16>, vector<16x128xf32> -> vector<16x128xf32>
    %c0_47 = arith.constant 0 : index
    %c0_48 = arith.constant 0 : index
    %c0_49 = arith.constant 0 : index
    %149 = vector.load %arg8[%c0_47, %c0_48, %c0_49] : memref<2x1x128xf32, #tpu.memory_space<vmem>>, vector<1x1x128xf32>
    %150 = vector.shape_cast %149 : vector<1x1x128xf32> to vector<1x128xf32>
    %151 = vector.broadcast %150 : vector<1x128xf32> to vector<16x128xf32>
    %152 = arith.addf %148, %151 : vector<16x128xf32>
    %cst_50 = arith.constant 0.000000e+00 : f32
    %153 = vector.broadcast %cst_50 : f32 to vector<16x128xf32>
    %154 = arith.maximumf %152, %153 : vector<16x128xf32>
    %155 = arith.truncf %154 : vector<16x128xf32> to vector<16x128xbf16>
    %c0_51 = arith.constant 0 : index
    %c0_52 = arith.constant 0 : index
    %c0_53 = arith.constant 0 : index
    %156 = vector.load %arg9[%c0_51, %c0_52, %c0_53] : memref<2x128x32xbf16, #tpu.memory_space<vmem>>, vector<1x128x32xbf16>
    %157 = vector.shape_cast %156 : vector<1x128x32xbf16> to vector<128x32xbf16>
    %cst_54 = arith.constant dense<0.000000e+00> : vector<16x32xf32>
    %158 = tpu.matmul %155, %157, %cst_54 {dimension_numbers = #tpu.dot_dimension_numbers<[1], [0], [0], [1], [0, 0, 1, 1], [], []>} : vector<16x128xbf16>, vector<128x32xbf16>, vector<16x32xf32> -> vector<16x32xf32>
    %c0_55 = arith.constant 0 : index
    %c0_56 = arith.constant 0 : index
    %c0_57 = arith.constant 0 : index
    %159 = vector.load %arg10[%c0_55, %c0_56, %c0_57] : memref<2x1x32xf32, #tpu.memory_space<vmem>>, vector<1x1x32xf32>
    %160 = vector.shape_cast %159 : vector<1x1x32xf32> to vector<1x32xf32>
    %161 = vector.broadcast %160 : vector<1x32xf32> to vector<16x32xf32>
    %162 = arith.addf %158, %161 : vector<16x32xf32>
    %163 = arith.addf %144, %162 : vector<16x32xf32>
    %c0_58 = arith.constant 0 : index
    %c0_59 = arith.constant 0 : index
    %c0_60 = arith.constant 0 : index
    %164 = vector.load %arg11[%c0_58, %c0_59, %c0_60] : memref<2x1x32xf32, #tpu.memory_space<vmem>>, vector<1x1x32xf32>
    %165 = vector.shape_cast %164 : vector<1x1x32xf32> to vector<1x32xf32>
    %c0_61 = arith.constant 0 : index
    %c0_62 = arith.constant 0 : index
    %c0_63 = arith.constant 0 : index
    %166 = vector.load %arg12[%c0_61, %c0_62, %c0_63] : memref<2x1x32xf32, #tpu.memory_space<vmem>>, vector<1x1x32xf32>
    %167 = vector.shape_cast %166 : vector<1x1x32xf32> to vector<1x32xf32>
    %cst_64 = arith.constant dense<0.000000e+00> : vector<16xf32>
    %168 = vector.multi_reduction <add>, %163, %cst_64 [1] : vector<16x32xf32> to vector<16xf32>
    %169 = vector.shape_cast %168 : vector<16xf32> to vector<16x1xf32>
    %cst_65 = arith.constant 3.200000e+01 : f32
    %170 = vector.broadcast %cst_65 : f32 to vector<16x1xf32>
    %171 = arith.divf %169, %170 : vector<16x1xf32>
    %172 = vector.broadcast %171 : vector<16x1xf32> to vector<16x32xf32>
    %173 = arith.subf %163, %172 : vector<16x32xf32>
    %174 = arith.mulf %173, %173 : vector<16x32xf32>
    %cst_66 = arith.constant dense<0.000000e+00> : vector<16xf32>
    %175 = vector.multi_reduction <add>, %174, %cst_66 [1] : vector<16x32xf32> to vector<16xf32>
    %176 = vector.shape_cast %175 : vector<16xf32> to vector<16x1xf32>
    %cst_67 = arith.constant 3.200000e+01 : f32
    %177 = vector.broadcast %cst_67 : f32 to vector<16x1xf32>
    %178 = arith.divf %176, %177 : vector<16x1xf32>
    %179 = vector.broadcast %171 : vector<16x1xf32> to vector<16x32xf32>
    %180 = arith.subf %163, %179 : vector<16x32xf32>
    %cst_68 = arith.constant 9.99999974E-6 : f32
    %181 = vector.broadcast %cst_68 : f32 to vector<16x1xf32>
    %182 = arith.addf %178, %181 : vector<16x1xf32>
    %183 = math.rsqrt %182 : vector<16x1xf32>
    %184 = vector.broadcast %183 : vector<16x1xf32> to vector<16x32xf32>
    %185 = arith.mulf %180, %184 : vector<16x32xf32>
    %186 = vector.broadcast %165 : vector<1x32xf32> to vector<16x32xf32>
    %187 = arith.mulf %185, %186 : vector<16x32xf32>
    %188 = vector.broadcast %167 : vector<1x32xf32> to vector<16x32xf32>
    %189 = arith.addf %187, %188 : vector<16x32xf32>
    %190 = arith.truncf %189 : vector<16x32xf32> to vector<16x32xbf16>
    %c1 = arith.constant 1 : index
    %c0_69 = arith.constant 0 : index
    %c0_70 = arith.constant 0 : index
    %191 = vector.load %arg2[%c1, %c0_69, %c0_70] : memref<2x32x192xbf16, #tpu.memory_space<vmem>>, vector<1x32x192xbf16>
    %192 = vector.shape_cast %191 : vector<1x32x192xbf16> to vector<32x192xbf16>
    %cst_71 = arith.constant dense<0.000000e+00> : vector<16x192xf32>
    %193 = tpu.matmul %190, %192, %cst_71 {dimension_numbers = #tpu.dot_dimension_numbers<[1], [0], [0], [1], [0, 0, 1, 1], [], []>} : vector<16x32xbf16>, vector<32x192xbf16>, vector<16x192xf32> -> vector<16x192xf32>
    %c1_72 = arith.constant 1 : index
    %c0_73 = arith.constant 0 : index
    %c0_74 = arith.constant 0 : index
    %194 = vector.load %arg3[%c1_72, %c0_73, %c0_74] : memref<2x1x192xf32, #tpu.memory_space<vmem>>, vector<1x1x192xf32>
    %195 = vector.shape_cast %194 : vector<1x1x192xf32> to vector<1x192xf32>
    %196 = vector.broadcast %195 : vector<1x192xf32> to vector<16x192xf32>
    %197 = arith.addf %193, %196 : vector<16x192xf32>
    %cst_75 = arith.constant 0.000000e+00 : f32
    %198 = vector.broadcast %cst_75 : f32 to vector<16x32xf32>
    %199 = vector.extract_strided_slice %197 {offsets = [0, 0], sizes = [16, 8], strides = [1, 1]} : vector<16x192xf32> to vector<16x8xf32>
    %200 = vector.shape_cast %199 : vector<16x8xf32> to vector<2x8x8xf32>
    %201 = arith.truncf %200 : vector<2x8x8xf32> to vector<2x8x8xbf16>
    %202 = vector.extract_strided_slice %197 {offsets = [0, 32], sizes = [16, 8], strides = [1, 1]} : vector<16x192xf32> to vector<16x8xf32>
    %203 = vector.shape_cast %202 : vector<16x8xf32> to vector<2x8x8xf32>
    %204 = arith.truncf %203 : vector<2x8x8xf32> to vector<2x8x8xbf16>
    %205 = vector.extract_strided_slice %197 {offsets = [0, 64], sizes = [16, 32], strides = [1, 1]} : vector<16x192xf32> to vector<16x32xf32>
    %206 = vector.shape_cast %205 : vector<16x32xf32> to vector<2x8x32xf32>
    %207 = arith.truncf %206 : vector<2x8x32xf32> to vector<2x8x32xbf16>
    "tpu.trace_start"() <{level = 10 : i32, message = "ble,bme->blm"}> : () -> ()
    %cst_76 = arith.constant dense<0.000000e+00> : vector<2x8x8xf32>
    %208 = tpu.matmul %201, %204, %cst_76 {dimension_numbers = #tpu.dot_dimension_numbers<[2], [2], [1], [1], [0, 0, 0, 1, 1, 1], [0], [0]>} : vector<2x8x8xbf16>, vector<2x8x8xbf16>, vector<2x8x8xf32> -> vector<2x8x8xf32>
    "tpu.trace_stop"() : () -> ()
    %cst_77 = arith.constant dense<0xFF800000> : vector<2x8xf32>
    %209 = vector.multi_reduction <maximumf>, %208, %cst_77 [2] : vector<2x8x8xf32> to vector<2x8xf32>
    %210 = vector.shape_cast %209 : vector<2x8xf32> to vector<2x8x1xf32>
    %211 = vector.broadcast %210 : vector<2x8x1xf32> to vector<2x8x8xf32>
    %212 = arith.subf %208, %211 : vector<2x8x8xf32>
    %213 = math.exp %212 : vector<2x8x8xf32>
    %cst_78 = arith.constant dense<0.000000e+00> : vector<2x8xf32>
    %214 = vector.multi_reduction <add>, %213, %cst_78 [2] : vector<2x8x8xf32> to vector<2x8xf32>
    %215 = vector.shape_cast %214 : vector<2x8xf32> to vector<2x8x1xf32>
    %216 = tpu.reciprocal %215 {approx = true} : vector<2x8x1xf32> -> vector<2x8x1xf32>
    %217 = vector.broadcast %216 : vector<2x8x1xf32> to vector<2x8x8xf32>
    %218 = arith.mulf %213, %217 : vector<2x8x8xf32>
    %219 = arith.truncf %218 : vector<2x8x8xf32> to vector<2x8x8xbf16>
    "tpu.trace_start"() <{level = 10 : i32, message = "blm,bmd->bld"}> : () -> ()
    %cst_79 = arith.constant dense<0.000000e+00> : vector<2x8x32xf32>
    %220 = tpu.matmul %219, %207, %cst_79 {dimension_numbers = #tpu.dot_dimension_numbers<[2], [1], [1], [2], [0, 0, 0, 1, 1, 2], [0], [0]>} : vector<2x8x8xbf16>, vector<2x8x32xbf16>, vector<2x8x32xf32> -> vector<2x8x32xf32>
    "tpu.trace_stop"() : () -> ()
    %221 = vector.shape_cast %220 : vector<2x8x32xf32> to vector<16x32xf32>
    %222 = arith.addf %198, %221 : vector<16x32xf32>
    %223 = vector.extract_strided_slice %197 {offsets = [0, 8], sizes = [16, 8], strides = [1, 1]} : vector<16x192xf32> to vector<16x8xf32>
    %224 = vector.shape_cast %223 : vector<16x8xf32> to vector<2x8x8xf32>
    %225 = arith.truncf %224 : vector<2x8x8xf32> to vector<2x8x8xbf16>
    %226 = vector.extract_strided_slice %197 {offsets = [0, 40], sizes = [16, 8], strides = [1, 1]} : vector<16x192xf32> to vector<16x8xf32>
    %227 = vector.shape_cast %226 : vector<16x8xf32> to vector<2x8x8xf32>
    %228 = arith.truncf %227 : vector<2x8x8xf32> to vector<2x8x8xbf16>
    %229 = vector.extract_strided_slice %197 {offsets = [0, 96], sizes = [16, 32], strides = [1, 1]} : vector<16x192xf32> to vector<16x32xf32>
    %230 = vector.shape_cast %229 : vector<16x32xf32> to vector<2x8x32xf32>
    %231 = arith.truncf %230 : vector<2x8x32xf32> to vector<2x8x32xbf16>
    "tpu.trace_start"() <{level = 10 : i32, message = "ble,bme->blm"}> : () -> ()
    %cst_80 = arith.constant dense<0.000000e+00> : vector<2x8x8xf32>
    %232 = tpu.matmul %225, %228, %cst_80 {dimension_numbers = #tpu.dot_dimension_numbers<[2], [2], [1], [1], [0, 0, 0, 1, 1, 1], [0], [0]>} : vector<2x8x8xbf16>, vector<2x8x8xbf16>, vector<2x8x8xf32> -> vector<2x8x8xf32>
    "tpu.trace_stop"() : () -> ()
    %cst_81 = arith.constant dense<0xFF800000> : vector<2x8xf32>
    %233 = vector.multi_reduction <maximumf>, %232, %cst_81 [2] : vector<2x8x8xf32> to vector<2x8xf32>
    %234 = vector.shape_cast %233 : vector<2x8xf32> to vector<2x8x1xf32>
    %235 = vector.broadcast %234 : vector<2x8x1xf32> to vector<2x8x8xf32>
    %236 = arith.subf %232, %235 : vector<2x8x8xf32>
    %237 = math.exp %236 : vector<2x8x8xf32>
    %cst_82 = arith.constant dense<0.000000e+00> : vector<2x8xf32>
    %238 = vector.multi_reduction <add>, %237, %cst_82 [2] : vector<2x8x8xf32> to vector<2x8xf32>
    %239 = vector.shape_cast %238 : vector<2x8xf32> to vector<2x8x1xf32>
    %240 = tpu.reciprocal %239 {approx = true} : vector<2x8x1xf32> -> vector<2x8x1xf32>
    %241 = vector.broadcast %240 : vector<2x8x1xf32> to vector<2x8x8xf32>
    %242 = arith.mulf %237, %241 : vector<2x8x8xf32>
    %243 = arith.truncf %242 : vector<2x8x8xf32> to vector<2x8x8xbf16>
    "tpu.trace_start"() <{level = 10 : i32, message = "blm,bmd->bld"}> : () -> ()
    %cst_83 = arith.constant dense<0.000000e+00> : vector<2x8x32xf32>
    %244 = tpu.matmul %243, %231, %cst_83 {dimension_numbers = #tpu.dot_dimension_numbers<[2], [1], [1], [2], [0, 0, 0, 1, 1, 2], [0], [0]>} : vector<2x8x8xbf16>, vector<2x8x32xbf16>, vector<2x8x32xf32> -> vector<2x8x32xf32>
    "tpu.trace_stop"() : () -> ()
    %245 = vector.shape_cast %244 : vector<2x8x32xf32> to vector<16x32xf32>
    %246 = arith.addf %222, %245 : vector<16x32xf32>
    %247 = vector.extract_strided_slice %197 {offsets = [0, 16], sizes = [16, 8], strides = [1, 1]} : vector<16x192xf32> to vector<16x8xf32>
    %248 = vector.shape_cast %247 : vector<16x8xf32> to vector<2x8x8xf32>
    %249 = arith.truncf %248 : vector<2x8x8xf32> to vector<2x8x8xbf16>
    %250 = vector.extract_strided_slice %197 {offsets = [0, 48], sizes = [16, 8], strides = [1, 1]} : vector<16x192xf32> to vector<16x8xf32>
    %251 = vector.shape_cast %250 : vector<16x8xf32> to vector<2x8x8xf32>
    %252 = arith.truncf %251 : vector<2x8x8xf32> to vector<2x8x8xbf16>
    %253 = vector.extract_strided_slice %197 {offsets = [0, 128], sizes = [16, 32], strides = [1, 1]} : vector<16x192xf32> to vector<16x32xf32>
    %254 = vector.shape_cast %253 : vector<16x32xf32> to vector<2x8x32xf32>
    %255 = arith.truncf %254 : vector<2x8x32xf32> to vector<2x8x32xbf16>
    "tpu.trace_start"() <{level = 10 : i32, message = "ble,bme->blm"}> : () -> ()
    %cst_84 = arith.constant dense<0.000000e+00> : vector<2x8x8xf32>
    %256 = tpu.matmul %249, %252, %cst_84 {dimension_numbers = #tpu.dot_dimension_numbers<[2], [2], [1], [1], [0, 0, 0, 1, 1, 1], [0], [0]>} : vector<2x8x8xbf16>, vector<2x8x8xbf16>, vector<2x8x8xf32> -> vector<2x8x8xf32>
    "tpu.trace_stop"() : () -> ()
    %cst_85 = arith.constant dense<0xFF800000> : vector<2x8xf32>
    %257 = vector.multi_reduction <maximumf>, %256, %cst_85 [2] : vector<2x8x8xf32> to vector<2x8xf32>
    %258 = vector.shape_cast %257 : vector<2x8xf32> to vector<2x8x1xf32>
    %259 = vector.broadcast %258 : vector<2x8x1xf32> to vector<2x8x8xf32>
    %260 = arith.subf %256, %259 : vector<2x8x8xf32>
    %261 = math.exp %260 : vector<2x8x8xf32>
    %cst_86 = arith.constant dense<0.000000e+00> : vector<2x8xf32>
    %262 = vector.multi_reduction <add>, %261, %cst_86 [2] : vector<2x8x8xf32> to vector<2x8xf32>
    %263 = vector.shape_cast %262 : vector<2x8xf32> to vector<2x8x1xf32>
    %264 = tpu.reciprocal %263 {approx = true} : vector<2x8x1xf32> -> vector<2x8x1xf32>
    %265 = vector.broadcast %264 : vector<2x8x1xf32> to vector<2x8x8xf32>
    %266 = arith.mulf %261, %265 : vector<2x8x8xf32>
    %267 = arith.truncf %266 : vector<2x8x8xf32> to vector<2x8x8xbf16>
    "tpu.trace_start"() <{level = 10 : i32, message = "blm,bmd->bld"}> : () -> ()
    %cst_87 = arith.constant dense<0.000000e+00> : vector<2x8x32xf32>
    %268 = tpu.matmul %267, %255, %cst_87 {dimension_numbers = #tpu.dot_dimension_numbers<[2], [1], [1], [2], [0, 0, 0, 1, 1, 2], [0], [0]>} : vector<2x8x8xbf16>, vector<2x8x32xbf16>, vector<2x8x32xf32> -> vector<2x8x32xf32>
    "tpu.trace_stop"() : () -> ()
    %269 = vector.shape_cast %268 : vector<2x8x32xf32> to vector<16x32xf32>
    %270 = arith.addf %246, %269 : vector<16x32xf32>
    %271 = vector.extract_strided_slice %197 {offsets = [0, 24], sizes = [16, 8], strides = [1, 1]} : vector<16x192xf32> to vector<16x8xf32>
    %272 = vector.shape_cast %271 : vector<16x8xf32> to vector<2x8x8xf32>
    %273 = arith.truncf %272 : vector<2x8x8xf32> to vector<2x8x8xbf16>
    %274 = vector.extract_strided_slice %197 {offsets = [0, 56], sizes = [16, 8], strides = [1, 1]} : vector<16x192xf32> to vector<16x8xf32>
    %275 = vector.shape_cast %274 : vector<16x8xf32> to vector<2x8x8xf32>
    %276 = arith.truncf %275 : vector<2x8x8xf32> to vector<2x8x8xbf16>
    %277 = vector.extract_strided_slice %197 {offsets = [0, 160], sizes = [16, 32], strides = [1, 1]} : vector<16x192xf32> to vector<16x32xf32>
    %278 = vector.shape_cast %277 : vector<16x32xf32> to vector<2x8x32xf32>
    %279 = arith.truncf %278 : vector<2x8x32xf32> to vector<2x8x32xbf16>
    "tpu.trace_start"() <{level = 10 : i32, message = "ble,bme->blm"}> : () -> ()
    %cst_88 = arith.constant dense<0.000000e+00> : vector<2x8x8xf32>
    %280 = tpu.matmul %273, %276, %cst_88 {dimension_numbers = #tpu.dot_dimension_numbers<[2], [2], [1], [1], [0, 0, 0, 1, 1, 1], [0], [0]>} : vector<2x8x8xbf16>, vector<2x8x8xbf16>, vector<2x8x8xf32> -> vector<2x8x8xf32>
    "tpu.trace_stop"() : () -> ()
    %cst_89 = arith.constant dense<0xFF800000> : vector<2x8xf32>
    %281 = vector.multi_reduction <maximumf>, %280, %cst_89 [2] : vector<2x8x8xf32> to vector<2x8xf32>
    %282 = vector.shape_cast %281 : vector<2x8xf32> to vector<2x8x1xf32>
    %283 = vector.broadcast %282 : vector<2x8x1xf32> to vector<2x8x8xf32>
    %284 = arith.subf %280, %283 : vector<2x8x8xf32>
    %285 = math.exp %284 : vector<2x8x8xf32>
    %cst_90 = arith.constant dense<0.000000e+00> : vector<2x8xf32>
    %286 = vector.multi_reduction <add>, %285, %cst_90 [2] : vector<2x8x8xf32> to vector<2x8xf32>
    %287 = vector.shape_cast %286 : vector<2x8xf32> to vector<2x8x1xf32>
    %288 = tpu.reciprocal %287 {approx = true} : vector<2x8x1xf32> -> vector<2x8x1xf32>
    %289 = vector.broadcast %288 : vector<2x8x1xf32> to vector<2x8x8xf32>
    %290 = arith.mulf %285, %289 : vector<2x8x8xf32>
    %291 = arith.truncf %290 : vector<2x8x8xf32> to vector<2x8x8xbf16>
    "tpu.trace_start"() <{level = 10 : i32, message = "blm,bmd->bld"}> : () -> ()
    %cst_91 = arith.constant dense<0.000000e+00> : vector<2x8x32xf32>
    %292 = tpu.matmul %291, %279, %cst_91 {dimension_numbers = #tpu.dot_dimension_numbers<[2], [1], [1], [2], [0, 0, 0, 1, 1, 2], [0], [0]>} : vector<2x8x8xbf16>, vector<2x8x32xbf16>, vector<2x8x32xf32> -> vector<2x8x32xf32>
    "tpu.trace_stop"() : () -> ()
    %293 = vector.shape_cast %292 : vector<2x8x32xf32> to vector<16x32xf32>
    %294 = arith.addf %270, %293 : vector<16x32xf32>
    %295 = vector.shape_cast %218 : vector<2x8x8xf32> to vector<2x1x8x8xf32>
    %296 = vector.shape_cast %242 : vector<2x8x8xf32> to vector<2x1x8x8xf32>
    %297 = vector.shape_cast %266 : vector<2x8x8xf32> to vector<2x1x8x8xf32>
    %298 = vector.shape_cast %290 : vector<2x8x8xf32> to vector<2x1x8x8xf32>
    %299 = tpu.concatenate %295, %296, %297, %298 in 1 : vector<2x1x8x8xf32>, vector<2x1x8x8xf32>, vector<2x1x8x8xf32>, vector<2x1x8x8xf32> -> vector<2x4x8x8xf32>
    %c1_92 = arith.constant 1 : index
    %c0_93 = arith.constant 0 : index
    %c0_94 = arith.constant 0 : index
    %c0_95 = arith.constant 0 : index
    %c0_96 = arith.constant 0 : index
    %300 = vector.load %arg16[%c1_92, %c0_93, %c0_94, %c0_95, %c0_96] : memref<2x2x4x8x8xf32, #tpu.memory_space<vmem>>, vector<1x2x4x8x8xf32>
    %301 = vector.shape_cast %300 : vector<1x2x4x8x8xf32> to vector<2x4x8x8xf32>
    %302 = vector.shape_cast %299 : vector<2x4x8x8xf32> to vector<1x2x4x8x8xf32>
    tpu.vector_store %arg16[%c1_92, %c0_93, %c0_94, %c0_95, %c0_96], %302 {strides = array<i32>} : memref<2x2x4x8x8xf32, #tpu.memory_space<vmem>>, vector<1x2x4x8x8xf32>,
    %303 = arith.addf %189, %294 : vector<16x32xf32>
    %c1_97 = arith.constant 1 : index
    %c0_98 = arith.constant 0 : index
    %c0_99 = arith.constant 0 : index
    %304 = vector.load %arg4[%c1_97, %c0_98, %c0_99] : memref<2x1x32xf32, #tpu.memory_space<vmem>>, vector<1x1x32xf32>
    %305 = vector.shape_cast %304 : vector<1x1x32xf32> to vector<1x32xf32>
    %306 = vector.broadcast %305 : vector<1x32xf32> to vector<16x32xf32>
    %307 = arith.addf %303, %306 : vector<16x32xf32>
    %c1_100 = arith.constant 1 : index
    %c0_101 = arith.constant 0 : index
    %c0_102 = arith.constant 0 : index
    %308 = vector.load %arg5[%c1_100, %c0_101, %c0_102] : memref<2x1x32xf32, #tpu.memory_space<vmem>>, vector<1x1x32xf32>
    %309 = vector.shape_cast %308 : vector<1x1x32xf32> to vector<1x32xf32>
    %c1_103 = arith.constant 1 : index
    %c0_104 = arith.constant 0 : index
    %c0_105 = arith.constant 0 : index
    %310 = vector.load %arg6[%c1_103, %c0_104, %c0_105] : memref<2x1x32xf32, #tpu.memory_space<vmem>>, vector<1x1x32xf32>
    %311 = vector.shape_cast %310 : vector<1x1x32xf32> to vector<1x32xf32>
    %cst_106 = arith.constant dense<0.000000e+00> : vector<16xf32>
    %312 = vector.multi_reduction <add>, %307, %cst_106 [1] : vector<16x32xf32> to vector<16xf32>
    %313 = vector.shape_cast %312 : vector<16xf32> to vector<16x1xf32>
    %cst_107 = arith.constant 3.200000e+01 : f32
    %314 = vector.broadcast %cst_107 : f32 to vector<16x1xf32>
    %315 = arith.divf %313, %314 : vector<16x1xf32>
    %316 = vector.broadcast %315 : vector<16x1xf32> to vector<16x32xf32>
    %317 = arith.subf %307, %316 : vector<16x32xf32>
    %318 = arith.mulf %317, %317 : vector<16x32xf32>
    %cst_108 = arith.constant dense<0.000000e+00> : vector<16xf32>
    %319 = vector.multi_reduction <add>, %318, %cst_108 [1] : vector<16x32xf32> to vector<16xf32>
    %320 = vector.shape_cast %319 : vector<16xf32> to vector<16x1xf32>
    %cst_109 = arith.constant 3.200000e+01 : f32
    %321 = vector.broadcast %cst_109 : f32 to vector<16x1xf32>
    %322 = arith.divf %320, %321 : vector<16x1xf32>
    %323 = vector.broadcast %315 : vector<16x1xf32> to vector<16x32xf32>
    %324 = arith.subf %307, %323 : vector<16x32xf32>
    %cst_110 = arith.constant 9.99999974E-6 : f32
    %325 = vector.broadcast %cst_110 : f32 to vector<16x1xf32>
    %326 = arith.addf %322, %325 : vector<16x1xf32>
    %327 = math.rsqrt %326 : vector<16x1xf32>
    %328 = vector.broadcast %327 : vector<16x1xf32> to vector<16x32xf32>
    %329 = arith.mulf %324, %328 : vector<16x32xf32>
    %330 = vector.broadcast %309 : vector<1x32xf32> to vector<16x32xf32>
    %331 = arith.mulf %329, %330 : vector<16x32xf32>
    %332 = vector.broadcast %311 : vector<1x32xf32> to vector<16x32xf32>
    %333 = arith.addf %331, %332 : vector<16x32xf32>
    %334 = arith.truncf %333 : vector<16x32xf32> to vector<16x32xbf16>
    %c1_111 = arith.constant 1 : index
    %c0_112 = arith.constant 0 : index
    %c0_113 = arith.constant 0 : index
    %335 = vector.load %arg7[%c1_111, %c0_112, %c0_113] : memref<2x32x128xbf16, #tpu.memory_space<vmem>>, vector<1x32x128xbf16>
    %336 = vector.shape_cast %335 : vector<1x32x128xbf16> to vector<32x128xbf16>
    %cst_114 = arith.constant dense<0.000000e+00> : vector<16x128xf32>
    %337 = tpu.matmul %334, %336, %cst_114 {dimension_numbers = #tpu.dot_dimension_numbers<[1], [0], [0], [1], [0, 0, 1, 1], [], []>} : vector<16x32xbf16>, vector<32x128xbf16>, vector<16x128xf32> -> vector<16x128xf32>
    %c1_115 = arith.constant 1 : index
    %c0_116 = arith.constant 0 : index
    %c0_117 = arith.constant 0 : index
    %338 = vector.load %arg8[%c1_115, %c0_116, %c0_117] : memref<2x1x128xf32, #tpu.memory_space<vmem>>, vector<1x1x128xf32>
    %339 = vector.shape_cast %338 : vector<1x1x128xf32> to vector<1x128xf32>
    %340 = vector.broadcast %339 : vector<1x128xf32> to vector<16x128xf32>
    %341 = arith.addf %337, %340 : vector<16x128xf32>
    %cst_118 = arith.constant 0.000000e+00 : f32
    %342 = vector.broadcast %cst_118 : f32 to vector<16x128xf32>
    %343 = arith.maximumf %341, %342 : vector<16x128xf32>
    %344 = arith.truncf %343 : vector<16x128xf32> to vector<16x128xbf16>
    %c1_119 = arith.constant 1 : index
    %c0_120 = arith.constant 0 : index
    %c0_121 = arith.constant 0 : index
    %345 = vector.load %arg9[%c1_119, %c0_120, %c0_121] : memref<2x128x32xbf16, #tpu.memory_space<vmem>>, vector<1x128x32xbf16>
    %346 = vector.shape_cast %345 : vector<1x128x32xbf16> to vector<128x32xbf16>
    %cst_122 = arith.constant dense<0.000000e+00> : vector<16x32xf32>
    %347 = tpu.matmul %344, %346, %cst_122 {dimension_numbers = #tpu.dot_dimension_numbers<[1], [0], [0], [1], [0, 0, 1, 1], [], []>} : vector<16x128xbf16>, vector<128x32xbf16>, vector<16x32xf32> -> vector<16x32xf32>
    %c1_123 = arith.constant 1 : index
    %c0_124 = arith.constant 0 : index
    %c0_125 = arith.constant 0 : index
    %348 = vector.load %arg10[%c1_123, %c0_124, %c0_125] : memref<2x1x32xf32, #tpu.memory_space<vmem>>, vector<1x1x32xf32>
    %349 = vector.shape_cast %348 : vector<1x1x32xf32> to vector<1x32xf32>
    %350 = vector.broadcast %349 : vector<1x32xf32> to vector<16x32xf32>
    %351 = arith.addf %347, %350 : vector<16x32xf32>
    %352 = arith.addf %333, %351 : vector<16x32xf32>
    %c1_126 = arith.constant 1 : index
    %c0_127 = arith.constant 0 : index
    %c0_128 = arith.constant 0 : index
    %353 = vector.load %arg11[%c1_126, %c0_127, %c0_128] : memref<2x1x32xf32, #tpu.memory_space<vmem>>, vector<1x1x32xf32>
    %354 = vector.shape_cast %353 : vector<1x1x32xf32> to vector<1x32xf32>
    %c1_129 = arith.constant 1 : index
    %c0_130 = arith.constant 0 : index
    %c0_131 = arith.constant 0 : index
    %355 = vector.load %arg12[%c1_129, %c0_130, %c0_131] : memref<2x1x32xf32, #tpu.memory_space<vmem>>, vector<1x1x32xf32>
    %356 = vector.shape_cast %355 : vector<1x1x32xf32> to vector<1x32xf32>
    %cst_132 = arith.constant dense<0.000000e+00> : vector<16xf32>
    %357 = vector.multi_reduction <add>, %352, %cst_132 [1] : vector<16x32xf32> to vector<16xf32>
    %358 = vector.shape_cast %357 : vector<16xf32> to vector<16x1xf32>
    %cst_133 = arith.constant 3.200000e+01 : f32
    %359 = vector.broadcast %cst_133 : f32 to vector<16x1xf32>
    %360 = arith.divf %358, %359 : vector<16x1xf32>
    %361 = vector.broadcast %360 : vector<16x1xf32> to vector<16x32xf32>
    %362 = arith.subf %352, %361 : vector<16x32xf32>
    %363 = arith.mulf %362, %362 : vector<16x32xf32>
    %cst_134 = arith.constant dense<0.000000e+00> : vector<16xf32>
    %364 = vector.multi_reduction <add>, %363, %cst_134 [1] : vector<16x32xf32> to vector<16xf32>
    %365 = vector.shape_cast %364 : vector<16xf32> to vector<16x1xf32>
    %cst_135 = arith.constant 3.200000e+01 : f32
    %366 = vector.broadcast %cst_135 : f32 to vector<16x1xf32>
    %367 = arith.divf %365, %366 : vector<16x1xf32>
    %368 = vector.broadcast %360 : vector<16x1xf32> to vector<16x32xf32>
    %369 = arith.subf %352, %368 : vector<16x32xf32>
    %cst_136 = arith.constant 9.99999974E-6 : f32
    %370 = vector.broadcast %cst_136 : f32 to vector<16x1xf32>
    %371 = arith.addf %367, %370 : vector<16x1xf32>
    %372 = math.rsqrt %371 : vector<16x1xf32>
    %373 = vector.broadcast %372 : vector<16x1xf32> to vector<16x32xf32>
    %374 = arith.mulf %369, %373 : vector<16x32xf32>
    %375 = vector.broadcast %354 : vector<1x32xf32> to vector<16x32xf32>
    %376 = arith.mulf %374, %375 : vector<16x32xf32>
    %377 = vector.broadcast %356 : vector<1x32xf32> to vector<16x32xf32>
    %378 = arith.addf %376, %377 : vector<16x32xf32>
    %c0_137 = arith.constant 0 : index
    %c0_138 = arith.constant 0 : index
    %379 = vector.load %arg13[%c0_137, %c0_138] : memref<1x32xf32, #tpu.memory_space<vmem>>, vector<1x32xf32>
    %c0_139 = arith.constant 0 : index
    %c0_140 = arith.constant 0 : index
    %380 = vector.load %arg14[%c0_139, %c0_140] : memref<1x32xf32, #tpu.memory_space<vmem>>, vector<1x32xf32>
    %cst_141 = arith.constant dense<0.000000e+00> : vector<16xf32>
    %381 = vector.multi_reduction <add>, %378, %cst_141 [1] : vector<16x32xf32> to vector<16xf32>
    %382 = vector.shape_cast %381 : vector<16xf32> to vector<16x1xf32>
    %cst_142 = arith.constant 3.200000e+01 : f32
    %383 = vector.broadcast %cst_142 : f32 to vector<16x1xf32>
    %384 = arith.divf %382, %383 : vector<16x1xf32>
    %385 = vector.broadcast %384 : vector<16x1xf32> to vector<16x32xf32>
    %386 = arith.subf %378, %385 : vector<16x32xf32>
    %387 = arith.mulf %386, %386 : vector<16x32xf32>
    %cst_143 = arith.constant dense<0.000000e+00> : vector<16xf32>
    %388 = vector.multi_reduction <add>, %387, %cst_143 [1] : vector<16x32xf32> to vector<16xf32>
    %389 = vector.shape_cast %388 : vector<16xf32> to vector<16x1xf32>
    %cst_144 = arith.constant 3.200000e+01 : f32
    %390 = vector.broadcast %cst_144 : f32 to vector<16x1xf32>
    %391 = arith.divf %389, %390 : vector<16x1xf32>
    %392 = vector.broadcast %384 : vector<16x1xf32> to vector<16x32xf32>
    %393 = arith.subf %378, %392 : vector<16x32xf32>
    %cst_145 = arith.constant 9.99999974E-6 : f32
    %394 = vector.broadcast %cst_145 : f32 to vector<16x1xf32>
    %395 = arith.addf %391, %394 : vector<16x1xf32>
    %396 = math.rsqrt %395 : vector<16x1xf32>
    %397 = vector.broadcast %396 : vector<16x1xf32> to vector<16x32xf32>
    %398 = arith.mulf %393, %397 : vector<16x32xf32>
    %399 = vector.broadcast %379 : vector<1x32xf32> to vector<16x32xf32>
    %400 = arith.mulf %398, %399 : vector<16x32xf32>
    %401 = vector.broadcast %380 : vector<1x32xf32> to vector<16x32xf32>
    %402 = arith.addf %400, %401 : vector<16x32xf32>
    %c0_146 = arith.constant 0 : index
    %c0_147 = arith.constant 0 : index
    %403 = vector.load %arg15[%c0_146, %c0_147] : memref<16x32xf32, #tpu.memory_space<vmem>>, vector<16x32xf32>
    tpu.vector_store %arg15[%c0_146, %c0_147], %402 {strides = array<i32>} : memref<16x32xf32, #tpu.memory_space<vmem>>, vector<16x32xf32>,
    return
  }
  func.func @transform_0(%arg0: i32) -> (i32, i32) {
    %c0_i32 = arith.constant 0 : i32
    %c0_i32_0 = arith.constant 0 : i32
    return %arg0, %c0_i32 : i32, i32
  }
  func.func @transform_1(%arg0: i32) -> (i32, i32, i32) {
    %c0_i32 = arith.constant 0 : i32
    %c0_i32_0 = arith.constant 0 : i32
    %c0_i32_1 = arith.constant 0 : i32
    %c0_i32_2 = arith.constant 0 : i32
    return %c0_i32, %c0_i32_0, %c0_i32_1 : i32, i32, i32
  }
  func.func @transform_2(%arg0: i32) -> (i32, i32, i32) {
    %c0_i32 = arith.constant 0 : i32
    %c0_i32_0 = arith.constant 0 : i32
    %c0_i32_1 = arith.constant 0 : i32
    %c0_i32_2 = arith.constant 0 : i32
    return %c0_i32, %c0_i32_0, %c0_i32_1 : i32, i32, i32
  }
  func.func @transform_3(%arg0: i32) -> (i32, i32, i32) {
    %c0_i32 = arith.constant 0 : i32
    %c0_i32_0 = arith.constant 0 : i32
    %c0_i32_1 = arith.constant 0 : i32
    %c0_i32_2 = arith.constant 0 : i32
    return %c0_i32, %c0_i32_0, %c0_i32_1 : i32, i32, i32
  }
  func.func @transform_4(%arg0: i32) -> (i32, i32, i32) {
    %c0_i32 = arith.constant 0 : i32
    %c0_i32_0 = arith.constant 0 : i32
    %c0_i32_1 = arith.constant 0 : i32
    %c0_i32_2 = arith.constant 0 : i32
    return %c0_i32, %c0_i32_0, %c0_i32_1 : i32, i32, i32
  }
  func.func @transform_5(%arg0: i32) -> (i32, i32, i32) {
    %c0_i32 = arith.constant 0 : i32
    %c0_i32_0 = arith.constant 0 : i32
    %c0_i32_1 = arith.constant 0 : i32
    %c0_i32_2 = arith.constant 0 : i32
    return %c0_i32, %c0_i32_0, %c0_i32_1 : i32, i32, i32
  }
  func.func @transform_6(%arg0: i32) -> (i32, i32, i32) {
    %c0_i32 = arith.constant 0 : i32
    %c0_i32_0 = arith.constant 0 : i32
    %c0_i32_1 = arith.constant 0 : i32
    %c0_i32_2 = arith.constant 0 : i32
    return %c0_i32, %c0_i32_0, %c0_i32_1 : i32, i32, i32
  }
  func.func @transform_7(%arg0: i32) -> (i32, i32, i32) {
    %c0_i32 = arith.constant 0 : i32
    %c0_i32_0 = arith.constant 0 : i32
    %c0_i32_1 = arith.constant 0 : i32
    %c0_i32_2 = arith.constant 0 : i32
    return %c0_i32, %c0_i32_0, %c0_i32_1 : i32, i32, i32
  }
  func.func @transform_8(%arg0: i32) -> (i32, i32, i32) {
    %c0_i32 = arith.constant 0 : i32
    %c0_i32_0 = arith.constant 0 : i32
    %c0_i32_1 = arith.constant 0 : i32
    %c0_i32_2 = arith.constant 0 : i32
    return %c0_i32, %c0_i32_0, %c0_i32_1 : i32, i32, i32
  }
  func.func @transform_9(%arg0: i32) -> (i32, i32, i32) {
    %c0_i32 = arith.constant 0 : i32
    %c0_i32_0 = arith.constant 0 : i32
    %c0_i32_1 = arith.constant 0 : i32
    %c0_i32_2 = arith.constant 0 : i32
    return %c0_i32, %c0_i32_0, %c0_i32_1 : i32, i32, i32
  }
  func.func @transform_10(%arg0: i32) -> (i32, i32, i32) {
    %c0_i32 = arith.constant 0 : i32
    %c0_i32_0 = arith.constant 0 : i32
    %c0_i32_1 = arith.constant 0 : i32
    %c0_i32_2 = arith.constant 0 : i32
    return %c0_i32, %c0_i32_0, %c0_i32_1 : i32, i32, i32
  }
  func.func @transform_11(%arg0: i32) -> (i32, i32, i32) {
    %c0_i32 = arith.constant 0 : i32
    %c0_i32_0 = arith.constant 0 : i32
    %c0_i32_1 = arith.constant 0 : i32
    %c0_i32_2 = arith.constant 0 : i32
    return %c0_i32, %c0_i32_0, %c0_i32_1 : i32, i32, i32
  }
  func.func @transform_12(%arg0: i32) -> (i32, i32) {
    %c0_i32 = arith.constant 0 : i32
    %c0_i32_0 = arith.constant 0 : i32
    %c0_i32_1 = arith.constant 0 : i32
    return %c0_i32, %c0_i32_0 : i32, i32
  }
  func.func @transform_13(%arg0: i32) -> (i32, i32) {
    %c0_i32 = arith.constant 0 : i32
    %c0_i32_0 = arith.constant 0 : i32
    %c0_i32_1 = arith.constant 0 : i32
    return %c0_i32, %c0_i32_0 : i32, i32
  }
  func.func @transform_14(%arg0: i32) -> (i32, i32) {
    %c0_i32 = arith.constant 0 : i32
    %c0_i32_0 = arith.constant 0 : i32
    return %arg0, %c0_i32 : i32, i32
  }
  func.func @transform_15(%arg0: i32) -> (i32, i32, i32, i32, i32) {
    %c0_i32 = arith.constant 0 : i32
    %c0_i32_0 = arith.constant 0 : i32
    %c0_i32_1 = arith.constant 0 : i32
    %c0_i32_2 = arith.constant 0 : i32
    %c0_i32_3 = arith.constant 0 : i32
    return %c0_i32, %arg0, %c0_i32_0, %c0_i32_1, %c0_i32_2 : i32, i32, i32, i32, i32
  }
}

</mosaic_0001>

<bundles_post_ra>
// kernel: encoder_forward.1
= control target key start
LH: loop header
LB: loop body
LE: loop exit
PB: predicated region body
PF: predicated region fallthrough
CT: control target
= control target key end

     0   :  { %v3272_v2 = vmov 0   ;;  %vm90_vm0 = vcmask 261120   ;;  %s4017_s0 = inlined_call_operand.vmem [shape: f32[16,32], index: 0, kind: input, shape index: {}]   ;;  %s4018_s1 = inlined_call_operand.vmem [shape: bf16[2,32,192], index: 1, kind: input, shape index: {}]   ;;  %s4019_s2 = inlined_call_operand.vmem [shape: f32[2,1,192], index: 2, kind: input, shape index: {}]   ;;  %s4020_s3 = inlined_call_operand.vmem [shape: f32[2,1,32], index: 3, kind: input, shape index: {}]   ;;  %s4021_s4 = inlined_call_operand.vmem [shape: f32[2,1,32], index: 4, kind: input, shape index: {}]   ;;  %s4022_s5 = inlined_call_operand.vmem [shape: f32[2,1,32], index: 5, kind: input, shape index: {}]   ;;  %s4023_s6 = inlined_call_operand.vmem [shape: bf16[2,32,128], index: 6, kind: input, shape index: {}]   ;;  %s4024_s7 = inlined_call_operand.vmem [shape: f32[2,1,128], index: 7, kind: input, shape index: {}]   ;;  %s4025_s8 = inlined_call_operand.vmem [shape: bf16[2,128,32], index: 8, kind: input, shape index: {}]   ;;  %s4026_s9 = inlined_call_operand.vmem [shape: f32[2,1,32], index: 9, kind: input, shape index: {}]   ;;  %s4027_s10 = inlined_call_operand.vmem [shape: f32[2,1,32], index: 10, kind: input, shape index: {}]   ;;  %s4028_s11 = inlined_call_operand.vmem [shape: f32[2,1,32], index: 11, kind: input, shape index: {}]   ;;  %s4029_s12 = inlined_call_operand.vmem [shape: f32[1,32], index: 12, kind: input, shape index: {}]   ;;  %s4030_s13 = inlined_call_operand.vmem [shape: f32[1,32], index: 13, kind: input, shape index: {}]   ;;  %s4031_s14 = inlined_call_operand.hbm [shape: f32[16,32], index: 14, kind: output, shape index: {0}]   ;;  %s4032_s15 = inlined_call_operand.vmem [shape: f32[2,2,4,8,8], index: 15, kind: output, shape index: {1}]  }
   0x1   :  { %v3132_v0 = vld [vmem:[%s4018_s1 + $0x4] ss:$8 sps:$4 sm:$0xff]   ;;  %v3134_v1 = vld [vmem:[%s4018_s1] ss:$8 sps:$4 sm:$0xff]   ;;  %126 = vmatprep.mubr.bf16.mxu1 %v3272_v2  ;;  %v3135_v3 = vld [vmem:[%s4018_s1 + $0x14] ss:$8 sps:$4 sm:$0xff]  }
   0x2   :  { %94 = vmatprep.subr.bf16.mxu1 %v3132_v0  ;;  %v3137_v4 = vld [vmem:[%s4018_s1 + $0x10] ss:$8 sps:$4 sm:$0xff]   ;;  %v3383_v5 = vld [vmem:[%s4017_s0] sm:$0xff]  ;;  %v3388_v6 = vld [vmem:[%s4017_s0 + $0x8] sm:$0xff] }
   0x3   :  { %95 = vmatpush1.bf16.msra.mxu1 %v3134_v1  ;;  %v53_v7 = vpack.c.bf16 %v3388_v6, %v3383_v5 }
   0x4   :  { %96 = vmatprep.subr.bf16.mxu1 %v3135_v3 }
   0x7   :  { %97 = vmatpush1.bf16.msra.mxu1 %v3137_v4 }
   0xa   :  { %2665 = vmatmul.mubr.msk.bf16.vlgmr.msra.gmra.mrb[0].mxu1 %vm90_vm0, %v53_v7 }
   0xb   :  { %21 = vsyncpa [#allocation3], 0  ;;  %v60_v8 = vlaneseq  ;;  %v3273_v10 = vmov 0.0   ;;  %v3401_v12 = vld [vmem:[%s4019_s2] sm:$0x3]  ;;  %vm3274_vm1 = vmmov 0  }
   0xc   :  { %2869 = vmatprep.subr.bf16.mxu1 %v3273_v10  ;;  %2887 = vmatprep.subr.bf16.mxu0 %v3273_v10  ;;  %s3275_s16 = smov 96   ;;  %vm142_vm2 = vcmask 64512   ;;  %s3276_s17 = smov 64   ;;  %vm267_vm3 = vcmask 1043456  }
   0xd   :  { %v3393_v9 = vshrl.u32 %v60_v8, 7  ;;  %2871 = vmatprep.mubr.msk.bf16.mxu1 %vm3274_vm1, %v3273_v10  ;;  %2889 = vmatprep.mubr.msk.bf16.mxu0 %vm3274_vm1, %v3273_v10  ;;  %s3277_s18 = smov 88   ;;  %s3278_s19 = smov 120  }
   0xe   :  { %s3279_s24 = smov 32   ;;  %s3280_s25 = smov 80  }
   0xf   :  { %v62_v11 = vsub.s32 0, %v3393_v9  ;;  %s3281_s26 = smov 112   ;;  %s3282_s30 = smov 72  }
  0x10   :  { %s4033_s20 = smov 104   ;;  %s4035_s29 = smov 104  }
  0x11   :  { %v63_v13 = vrot.slane %v3401_v12, %v62_v11  ;;  %s3284_s28 = smov [#allocation2]  }
  0xdd   :  { %v128_v14 = vpop.f32.mrb[0].mxu1 }
  0xde   :  { %v129_v15 = vadd.f32 %v128_v14, %v63_v13  ;;  %v3410_v16 = vpop.f32.mrb[1].mxu1 }
  0xdf   :  { %v132_v17 = vpop.f32.mrb[2].mxu1 }
  0xe0   :  { %v3412_v18 = vpack.c.bf16 %v129_v15, %v129_v15  ;;  %v133_v19 = vadd.f32 %v132_v17, %v63_v13  ;;  %v3414_v20 = vpop.f32.mrb[3].mxu1 }
  0xe2   :  { %140 = vrot.lane.b32.xlu0 %v3412_v18, %s3275_s16  ;;  %v3418_v21 = vpack.c.bf16 %v133_v19, %v133_v19 }
  0xe6   :  { %190 = vrot.lane.b32.xlu0 %v3418_v21, %s3275_s16 }
 0x154   :  { %v141_v22 = vpop.permute.xlu0 %140 }
 0x155   :  { %v147_v23 = vsel %vm142_vm2, %v141_v22, 0 }
 0x156   :  { %2870 = vmatpush3.bf16.xpose.msra.mxu1 %v147_v23 }
 0x157   :  { %2875 = vmatprep.subr.bf16.mxu1 %v3273_v10 }
 0x158   :  { %v191_v24 = vpop.permute.xlu0 %190 }
 0x159   :  { %v196_v25 = vsel %vm142_vm2, %v191_v24, 0 }
 0x15d   :  { %2872 = vmatmul.mubr.msk.bf16.vlgmr.msra.gmra.mrb[4].mxu1 %vm142_vm2, %v3412_v18 }
 0x15e   :  { %2876 = vmatpush3.bf16.xpose.msra.mxu1 %v196_v25  ;;  %2877 = vmatprep.mubr.msk.bf16.mxu1 %vm3274_vm1, %v3273_v10 }
 0x15f   :  { %2881 = vmatprep.subr.bf16.mxu1 %v3273_v10 }
 0x165   :  { %2878 = vmatmul.mubr.msk.bf16.vlgmr.msra.gmra.mrb[8].mxu1 %vm142_vm2, %v3418_v21 }
 0x166   :  { %2883 = vmatprep.mubr.msk.bf16.mxu1 %vm3274_vm1, %v3273_v10 }
 0x230   :  { %v183_v26 = vpop.f32.mrb[4].mxu1 }
 0x231   :  { %v2873_v27 = vpop.f32.mrb[5].mxu1  ;;  %v238_v28 = vsel %vm142_vm2, %v183_v26, -inf }
 0x232   :  { %239 = vmax.xlane.f32.xlu1 %v238_v28  ;;  %v186_v29 = vpop.f32.mrb[6].mxu1 }
 0x233   :  { %v2874_v30 = vpop.f32.mrb[7].mxu1 }
 0x238   :  { %v232_v31 = vpop.f32.mrb[8].mxu1 }
 0x239   :  { %v2879_v32 = vpop.f32.mrb[9].mxu1  ;;  %v241_v33 = vsel %vm142_vm2, %v232_v31, -inf }
 0x23a   :  { %242 = vmax.xlane.f32.xlu1 %v241_v33  ;;  %v235_v34 = vpop.f32.mrb[10].mxu1 }
 0x23b   :  { %v2880_v35 = vpop.f32.mrb[11].mxu1 }
 0x24b   :  { %262 = vrot.lane.b32.xlu1 %v3412_v18, %s3276_s17 }
 0x24f   :  { %311 = vrot.lane.b32.xlu1 %v3418_v21, %s3276_s17 }
 0x253   :  { %363 = vrot.lane.b32.xlu1 %v3412_v18, %s3277_s18 }
 0x2bf   :  { %v240_v36 = vpop.xlane.xlu1 %239 }
 0x2c0   :  { %v244_v37 = vsub.f32 %v183_v26, %v240_v36 }
 0x2c2   :  { %v246_v38 = vmul.f32 1.442695, %v244_v37 }
 0x2c4   :  { %3164 = vpow2.f32 %v246_v38 }
 0x2c7   :  { %v243_v39 = vpop.xlane.xlu1 %242 }
 0x2c8   :  { %v245_v40 = vsub.f32 %v232_v31, %v243_v39 }
 0x2ca   :  { %v248_v41 = vmul.f32 1.442695, %v245_v40 }
 0x2cb   :  { %v263_v42 = vpop.permute.xlu1 %262 }
 0x2cc   :  { %3166 = vpow2.f32 %v248_v41  ;;  %v269_v43 = vsel %vm267_vm3, %v263_v42, 0 }
 0x2cd   :  { %2882 = vmatpush3.bf16.msra.mxu1 %v269_v43 }
 0x2ce   :  { %v3165_v44 = vpop.eup %3164  ;;  %2893 = vmatprep.subr.bf16.mxu1 %v3273_v10 }
 0x2cf   :  { %v312_v45 = vpop.permute.xlu1 %311  ;;  %v250_v46 = vsel %vm142_vm2, %v3165_v44, 0.0 }
 0x2d0   :  { %251 = vadd.xlane.f32.xlu0 %v250_v46  ;;  %v317_v47 = vsel %vm267_vm3, %v312_v45, 0  ;;  %v66_v45 = vsub.s32 1, %v3393_v9 }
 0x2d1   :  { %2888 = vmatpush3.bf16.msra.mxu0 %v317_v47 }
 0x2d2   :  { %2899 = vmatprep.subr.bf16.mxu0 %v3273_v10 }
 0x2d3   :  { %v364_v51 = vpop.permute.xlu1 %363 }
 0x2d4   :  { %v369_v56 = vsel %vm142_vm2, %v364_v51, 0 }
 0x2d6   :  { %v3167_v48 = vpop.eup %3166 }
 0x2d7   :  { %v253_v49 = vsel %vm142_vm2, %v3167_v48, 0.0 }
 0x2d8   :  { %254 = vadd.xlane.f32.xlu1 %v253_v49 }
 0x2e6   :  { %361 = vrot.lane.b32.xlu0 %v3412_v18, %s3278_s19 }
 0x2e9   :  { %413 = vrot.lane.b32.xlu1 %v3418_v21, %s3277_s18 }
 0x2ed   :  { %411 = vrot.lane.b32.xlu1 %v3418_v21, %s3278_s19 }
 0x35d   :  { %v252_v50 = vpop.xlane.xlu0 %251 }
 0x35e   :  { %3168 = vrcp.f32 %v252_v50 }
 0x361   :  { %v362_v61 = vpop.permute.xlu0 %361 }
 0x365   :  { %v255_v52 = vpop.xlane.xlu1 %254 }
 0x366   :  { %3170 = vrcp.f32 %v255_v52 }
 0x368   :  { %v3169_v53 = vpop.eup %3168 }
 0x369   :  { %v258_v54 = vmul.f32 %v3169_v53, %v3165_v44  ;;  %v414_v59 = vpop.permute.xlu1 %413 }
 0x36a   :  { %v419_v62 = vsel %vm142_vm2, %v414_v59, 0 }
 0x36b   :  { %1027 = vst.msk [vmem:[%s4032_s15] sm:$0xff] %vm142_vm2, %v258_v54  ;;  %v260_v55 = vpack.c.bf16 %v258_v54, %v258_v54 }
 0x36d   :  { %2884 = vmatmul.mubr.msk.bf16.vlgmr.msra.gmra.mrb[12].mxu1 %vm142_vm2, %v260_v55  ;;  %v412_v63 = vpop.permute.xlu1 %411 }
 0x36e   :  { %2894 = vmatpush3.bf16.xpose.msra.mxu1 %v369_v56  ;;  %2895 = vmatprep.mubr.msk.bf16.mxu1 %vm3274_vm1, %v3273_v10 }
 0x36f   :  { %2905 = vmatprep.subr.bf16.mxu1 %v3273_v10 }
 0x370   :  { %v3171_v57 = vpop.eup %3170 }
 0x371   :  { %v259_v58 = vmul.f32 %v3171_v57, %v3167_v48  ;;  %v67_v48 = vrot.slane %v3401_v12, %v66_v45 }
 0x373   :  { %v261_v60 = vpack.c.bf16 %v259_v58, %v259_v58  ;;  %1031 = vst.msk [vmem:[%s4032_s15 + $0x20] sm:$0xff] %vm142_vm2, %v259_v58  ;;  %v131_v51 = vadd.f32 %v3410_v16, %v67_v48  ;;  %v135_v58 = vadd.f32 %v3414_v20, %v67_v48 }
 0x375   :  { %2890 = vmatmul.mubr.msk.bf16.vlgmr.msra.gmra.mrb[0].mxu0 %vm142_vm2, %v261_v60  ;;  %2896 = vmatmul.mubr.msk.bf16.vlgmr.msra.gmra.mrb[16].mxu1 %vm142_vm2, %v362_v61  ;;  %v3516_v53 = vpack.c.bf16 %v131_v51, %v131_v51  ;;  %v3534_v60 = vpack.c.bf16 %v135_v58, %v135_v58 }
 0x376   :  { %2900 = vmatpush3.bf16.xpose.msra.mxu0 %v419_v62  ;;  %2901 = vmatprep.mubr.msk.bf16.mxu0 %vm3274_vm1, %v3273_v10 }
 0x377   :  { %2911 = vmatprep.subr.bf16.mxu0 %v3273_v10  ;;  %2907 = vmatprep.mubr.msk.bf16.mxu1 %vm3274_vm1, %v3273_v10  ;;  %v713_v57 = vsel %vm267_vm3, %v3516_v53, 0  ;;  %v759_v61 = vsel %vm267_vm3, %v3534_v60, 0 }
 0x37d   :  { %2902 = vmatmul.mubr.msk.bf16.vlgmr.msra.gmra.mrb[4].mxu0 %vm142_vm2, %v412_v63 }
 0x37e   :  { %2913 = vmatprep.mubr.msk.bf16.mxu0 %vm3274_vm1, %v3273_v10 }
 0x440   :  { %v3478_v0 = vpop.f32.mrb[12].mxu1 }
 0x441   :  { %v2885_v1 = vpop.f32.mrb[13].mxu1 }
 0x442   :  { %v308_v3 = vpop.f32.mrb[14].mxu1 }
 0x443   :  { %v2886_v4 = vpop.f32.mrb[15].mxu1 }
 0x448   :  { %v3480_v7 = vpop.f32.mrb[0].mxu0  ;;  %v405_v8 = vpop.f32.mrb[16].mxu1 }
 0x449   :  { %v2891_v13 = vpop.f32.mrb[1].mxu0  ;;  %v2897_v14 = vpop.f32.mrb[17].mxu1  ;;  %v461_v15 = vsel %vm142_vm2, %v405_v8, -inf }
 0x44a   :  { %v356_v17 = vpop.f32.mrb[2].mxu0  ;;  %462 = vmax.xlane.f32.xlu1 %v461_v15  ;;  %v408_v19 = vpop.f32.mrb[18].mxu1 }
 0x44b   :  { %v2892_v22 = vpop.f32.mrb[3].mxu0  ;;  %v2898_v23 = vpop.f32.mrb[19].mxu1 }
 0x450   :  { %v455_v24 = vpop.f32.mrb[4].mxu0 }
 0x451   :  { %v2903_v25 = vpop.f32.mrb[5].mxu0  ;;  %v464_v26 = vsel %vm142_vm2, %v455_v24, -inf }
 0x452   :  { %465 = vmax.xlane.f32.xlu0 %v464_v26  ;;  %v458_v27 = vpop.f32.mrb[6].mxu0 }
 0x453   :  { %v2904_v28 = vpop.f32.mrb[7].mxu0 }
 0x45b   :  { %485 = vrot.lane.b32.xlu1 %v3412_v18, %s3279_s24 }
 0x45f   :  { %587 = vrot.lane.b32.xlu1 %v3412_v18, %s3280_s25 }
 0x468   :  { %533 = vrot.lane.b32.xlu0 %v3418_v21, %s3279_s24 }
 0x46c   :  { %585 = vrot.lane.b32.xlu0 %v3412_v18, %s3281_s26 }
 0x4d7   :  { %v463_v29 = vpop.xlane.xlu1 %462 }
 0x4d8   :  { %v467_v30 = vsub.f32 %v405_v8, %v463_v29 }
 0x4da   :  { %v469_v31 = vmul.f32 1.442695, %v467_v30 }
 0x4db   :  { %v486_v32 = vpop.permute.xlu1 %485 }
 0x4dc   :  { %3172 = vpow2.f32 %v469_v31  ;;  %v491_v33 = vsel %vm267_vm3, %v486_v32, 0 }
 0x4dd   :  { %2906 = vmatpush3.bf16.msra.mxu1 %v491_v33 }
 0x4de   :  { %2917 = vmatprep.subr.bf16.mxu1 %v3273_v10 }
 0x4df   :  { %v466_v34 = vpop.xlane.xlu0 %465  ;;  %v588_v43 = vpop.permute.xlu1 %587 }
 0x4e0   :  { %v468_v35 = vsub.f32 %v455_v24, %v466_v34  ;;  %v593_v52 = vsel %vm142_vm2, %v588_v43, 0 }
 0x4e2   :  { %v471_v36 = vmul.f32 1.442695, %v468_v35 }
 0x4e3   :  { %v534_v37 = vpop.permute.xlu0 %533 }
 0x4e4   :  { %3174 = vpow2.f32 %v471_v36  ;;  %v539_v38 = vsel %vm267_vm3, %v534_v37, 0 }
 0x4e5   :  { %2912 = vmatpush3.bf16.msra.mxu0 %v539_v38 }
 0x4e6   :  { %v3173_v39 = vpop.eup %3172  ;;  %2923 = vmatprep.subr.bf16.mxu0 %v3273_v10 }
 0x4e7   :  { %v473_v40 = vsel %vm142_vm2, %v3173_v39, 0.0  ;;  %v586_v56 = vpop.permute.xlu0 %585 }
 0x4e8   :  { %474 = vadd.xlane.f32.xlu1 %v473_v40 }
 0x4ee   :  { %v3175_v41 = vpop.eup %3174 }
 0x4ef   :  { %v476_v42 = vsel %vm142_vm2, %v3175_v41, 0.0 }
 0x4f0   :  { %477 = vadd.xlane.f32.xlu1 %v476_v42 }
 0x501   :  { %637 = vrot.lane.b32.xlu1 %v3418_v21, %s3280_s25 }
 0x505   :  { %635 = vrot.lane.b32.xlu1 %v3418_v21, %s3281_s26 }
 0x575   :  { %v475_v44 = vpop.xlane.xlu1 %474 }
 0x576   :  { %3176 = vrcp.f32 %v475_v44 }
 0x57d   :  { %v478_v46 = vpop.xlane.xlu1 %477 }
 0x57e   :  { %3178 = vrcp.f32 %v478_v46 }
 0x580   :  { %v3177_v47 = vpop.eup %3176 }
 0x581   :  { %v481_v49 = vmul.f32 %v3177_v47, %v3173_v39  ;;  %v638_v55 = vpop.permute.xlu1 %637 }
 0x582   :  { %v643_v59 = vsel %vm142_vm2, %v638_v55, 0 }
 0x583   :  { %1028 = vst.msk [vmem:[%s4032_s15 + $0x8] sm:$0xff] %vm142_vm2, %v481_v49  ;;  %v483_v50 = vpack.c.bf16 %v481_v49, %v481_v49 }
 0x585   :  { %2908 = vmatmul.mubr.msk.bf16.vlgmr.msra.gmra.mrb[20].mxu1 %vm142_vm2, %v483_v50  ;;  %v636_v20 = vpop.permute.xlu1 %635 }
 0x586   :  { %2918 = vmatpush3.bf16.xpose.msra.mxu1 %v593_v52  ;;  %2919 = vmatprep.mubr.msk.bf16.mxu1 %vm3274_vm1, %v3273_v10 }
 0x587   :  { %2929 = vmatprep.subr.bf16.mxu1 %v3273_v10 }
 0x588   :  { %v3179_v12 = vpop.eup %3178 }
 0x589   :  { %v482_v54 = vmul.f32 %v3179_v12, %v3175_v41 }
 0x58b   :  { %1032 = vst.msk [vmem:[%s4032_s15 + $0x28] sm:$0xff] %vm142_vm2, %v482_v54  ;;  %v484_v16 = vpack.c.bf16 %v482_v54, %v482_v54 }
 0x58d   :  { %2914 = vmatmul.mubr.msk.bf16.vlgmr.msra.gmra.mrb[8].mxu0 %vm142_vm2, %v484_v16  ;;  %2920 = vmatmul.mubr.msk.bf16.vlgmr.msra.gmra.mrb[24].mxu1 %vm142_vm2, %v586_v56 }
 0x58e   :  { %2924 = vmatpush3.bf16.xpose.msra.mxu0 %v643_v59  ;;  %2930 = vmatpush3.bf16.msra.mxu1 %v713_v57 }
 0x58f   :  { %2925 = vmatprep.mubr.msk.bf16.mxu0 %vm3274_vm1, %v3273_v10  ;;  %2935 = vmatprep.subr.bf16.mxu0 %v3273_v10 }
 0x590   :  { %2931 = vmatprep.mubr.msk.bf16.mxu1 %vm3274_vm1, %v3273_v10  ;;  %2941 = vmatprep.subr.bf16.mxu1 %v3273_v10 }
 0x595   :  { %2926 = vmatmul.mubr.msk.bf16.vlgmr.msra.gmra.mrb[12].mxu0 %vm142_vm2, %v636_v20 }
 0x596   :  { %2936 = vmatpush3.bf16.msra.mxu0 %v759_v61  ;;  %2937 = vmatprep.mubr.msk.bf16.mxu0 %vm3274_vm1, %v3273_v10 }
 0x597   :  { %2947 = vmatprep.subr.bf16.mxu0 %v3273_v10 }
 0x658   :  { %v527_v62 = vpop.f32.mrb[20].mxu1 }
 0x659   :  { %v3543_v63 = vadd.f32 %v527_v62, %v3478_v0  ;;  %v2909_v1 = vpop.f32.mrb[21].mxu1 }
 0x65a   :  { %v530_v3 = vpop.f32.mrb[22].mxu1 }
 0x65b   :  { %v2910_v4 = vpop.f32.mrb[23].mxu1 }
 0x660   :  { %v575_v8 = vpop.f32.mrb[8].mxu0  ;;  %v629_v13 = vpop.f32.mrb[24].mxu1 }
 0x661   :  { %v3546_v14 = vadd.f32 %v575_v8, %v3480_v7  ;;  %v2915_v15 = vpop.f32.mrb[9].mxu0  ;;  %v2921_v17 = vpop.f32.mrb[25].mxu1  ;;  %v685_v19 = vsel %vm142_vm2, %v629_v13, -inf }
 0x662   :  { %v578_v22 = vpop.f32.mrb[10].mxu0  ;;  %686 = vmax.xlane.f32.xlu0 %v685_v19  ;;  %v632_v23 = vpop.f32.mrb[26].mxu1 }
 0x663   :  { %v2916_v24 = vpop.f32.mrb[11].mxu0  ;;  %v2922_v25 = vpop.f32.mrb[27].mxu1 }
 0x668   :  { %v679_v26 = vpop.f32.mrb[12].mxu0 }
 0x669   :  { %v2927_v0 = vpop.f32.mrb[13].mxu0  ;;  %v688_v27 = vsel %vm142_vm2, %v679_v26, -inf }
 0x66a   :  { %689 = vmax.xlane.f32.xlu1 %v688_v27  ;;  %v682_v28 = vpop.f32.mrb[14].mxu0 }
 0x66b   :  { %v2928_v29 = vpop.f32.mrb[15].mxu0 }
 0x67b   :  { %805 = vrot.lane.b32.xlu1 %v3412_v18, %s3282_s30 }
 0x67f   :  { %803 = vrot.lane.b32.xlu1 %v3412_v18, %s4033_s20 }
 0x683   :  { %853 = vrot.lane.b32.xlu1 %v3418_v21, %s4033_s20 }
 0x6ef   :  { %v687_v7 = vpop.xlane.xlu0 %686 }
 0x6f0   :  { %v691_v30 = vsub.f32 %v629_v13, %v687_v7 }
 0x6f2   :  { %v693_v31 = vmul.f32 1.442695, %v691_v30 }
 0x6f4   :  { %3180 = vpow2.f32 %v693_v31 }
 0x6f7   :  { %v690_v32 = vpop.xlane.xlu1 %689 }
 0x6f8   :  { %v692_v33 = vsub.f32 %v679_v26, %v690_v32 }
 0x6fa   :  { %v695_v34 = vmul.f32 1.442695, %v692_v33 }
 0x6fb   :  { %v806_v42 = vpop.permute.xlu1 %805 }
 0x6fc   :  { %3182 = vpow2.f32 %v695_v34  ;;  %v811_v44 = vsel %vm142_vm2, %v806_v42, 0 }
 0x6fe   :  { %v3181_v35 = vpop.eup %3180 }
 0x6ff   :  { %v697_v36 = vsel %vm142_vm2, %v3181_v35, 0.0  ;;  %v804_v49 = vpop.permute.xlu1 %803 }
 0x700   :  { %698 = vadd.xlane.f32.xlu0 %v697_v36 }
 0x703   :  { %v854_v51 = vpop.permute.xlu1 %853 }
 0x706   :  { %v3183_v37 = vpop.eup %3182 }
 0x707   :  { %v700_v38 = vsel %vm142_vm2, %v3183_v37, 0.0 }
 0x708   :  { %701 = vadd.xlane.f32.xlu0 %v700_v38 }
 0x71e   :  { %855 = vrot.lane.b32.xlu0 %v3418_v21, %s3282_s30 }
 0x78d   :  { %v699_v18 = vpop.xlane.xlu0 %698 }
 0x78e   :  { %3184 = vrcp.f32 %v699_v18 }
 0x795   :  { %v702_v39 = vpop.xlane.xlu0 %701 }
 0x796   :  { %3186 = vrcp.f32 %v702_v39 }
 0x798   :  { %v3185_v40 = vpop.eup %3184 }
 0x799   :  { %v705_v41 = vmul.f32 %v3185_v40, %v3181_v35  ;;  %v856_v47 = vpop.permute.xlu0 %855 }
 0x79a   :  { %v861_v50 = vsel %vm142_vm2, %v856_v47, 0 }
 0x79b   :  { %1029 = vst.msk [vmem:[%s4032_s15 + $0x10] sm:$0xff] %vm142_vm2, %v705_v41  ;;  %v707_v43 = vpack.c.bf16 %v705_v41, %v705_v41  ;;  %v2682_v41 = vld [vmem:[%s4020_s3] ss:$0 sm:$0xff] }
 0x79d   :  { %2932 = vmatmul.mubr.msk.bf16.vlgmr.msra.gmra.mrb[28].mxu1 %vm142_vm2, %v707_v43 }
 0x79e   :  { %2942 = vmatpush3.bf16.xpose.msra.mxu1 %v811_v44  ;;  %2943 = vmatprep.mubr.msk.bf16.mxu1 %vm3274_vm1, %v3273_v10 }
 0x79f   :  { %2953 = vmatprep.subr.bf16.mxu1 %v3273_v10 }
 0x7a0   :  { %v3187_v21 = vpop.eup %3186 }
 0x7a1   :  { %v706_v46 = vmul.f32 %v3187_v21, %v3183_v37 }
 0x7a3   :  { %1033 = vst.msk [vmem:[%s4032_s15 + $0x30] sm:$0xff] %vm142_vm2, %v706_v46  ;;  %v708_v48 = vpack.c.bf16 %v706_v46, %v706_v46 }
 0x7a5   :  { %2938 = vmatmul.mubr.msk.bf16.vlgmr.msra.gmra.mrb[16].mxu0 %vm142_vm2, %v708_v48  ;;  %2944 = vmatmul.mubr.msk.bf16.vlgmr.msra.gmra.mrb[32].mxu1 %vm142_vm2, %v804_v49 }
 0x7a6   :  { %2948 = vmatpush3.bf16.xpose.msra.mxu0 %v861_v50  ;;  %2949 = vmatprep.mubr.msk.bf16.mxu0 %vm3274_vm1, %v3273_v10 }
 0x7a7   :  { %2959 = vmatprep.subr.bf16.mxu0 %v3273_v10  ;;  %2955 = vmatprep.mubr.msk.bf16.mxu1 %vm3274_vm1, %v3273_v10 }
 0x7ad   :  { %2950 = vmatmul.mubr.msk.bf16.vlgmr.msra.gmra.mrb[20].mxu0 %vm142_vm2, %v854_v51 }
 0x7ae   :  { %2961 = vmatprep.mubr.msk.bf16.mxu0 %vm3274_vm1, %v3273_v10 }
 0x870   :  { %v749_v52 = vpop.f32.mrb[28].mxu1 }
 0x871   :  { %v801_v12 = vadd.f32 %v749_v52, %v3543_v63  ;;  %v2933_v54 = vpop.f32.mrb[29].mxu1 }
 0x872   :  { %v752_v55 = vpop.f32.mrb[30].mxu1 }
 0x873   :  { %v2934_v16 = vpop.f32.mrb[31].mxu1 }
 0x878   :  { %v795_v56 = vpop.f32.mrb[16].mxu0  ;;  %v847_v57 = vpop.f32.mrb[32].mxu1 }
 0x879   :  { %v3586_v58 = vadd.f32 %v795_v56, %v3546_v14  ;;  %v2939_v59 = vpop.f32.mrb[17].mxu0  ;;  %v2945_v20 = vpop.f32.mrb[33].mxu1  ;;  %v903_v61 = vsel %vm142_vm2, %v847_v57, -inf }
 0x87a   :  { %v798_v62 = vpop.f32.mrb[18].mxu0  ;;  %904 = vmax.xlane.f32.xlu0 %v903_v61  ;;  %v850_v1 = vpop.f32.mrb[34].mxu1 }
 0x87b   :  { %v2940_v3 = vpop.f32.mrb[19].mxu0  ;;  %v2946_v4 = vpop.f32.mrb[35].mxu1  ;;  %v3139_v62 = vld [vmem:[%s4023_s6 + $0x8] sm:$0xff]   ;;  %v3140_v1 = vld [vmem:[%s4025_s8] sm:$0xff]  }
 0x87c   :  { %v3141_v3 = vld [vmem:[%s4025_s8 + $0x8] sm:$0xff]   ;;  %v3142_v4 = vld [vmem:[%s4025_s8 + $0x10] sm:$0xff]  }
 0x880   :  { %v897_v8 = vpop.f32.mrb[20].mxu0 }
 0x881   :  { %v2951_v13 = vpop.f32.mrb[21].mxu0  ;;  %v906_v63 = vsel %vm142_vm2, %v897_v8, -inf }
 0x882   :  { %907 = vmax.xlane.f32.xlu1 %v906_v63  ;;  %v900_v15 = vpop.f32.mrb[22].mxu0  ;;  %v3144_v13 = vld [vmem:[%s4025_s8 + $0x20] sm:$0xff]   ;;  %v3145_v63 = vld [vmem:[%s4025_s8 + $0x28] sm:$0xff]  }
 0x883   :  { %v2952_v17 = vpop.f32.mrb[23].mxu0 }
 0x893   :  { %928 = vrot.lane.b32.xlu1 %v3516_v53, %s3275_s16 }
 0x907   :  { %v905_v14 = vpop.xlane.xlu0 %904 }
 0x908   :  { %v909_v19 = vsub.f32 %v847_v57, %v905_v14 }
 0x90a   :  { %v911_v22 = vmul.f32 1.442695, %v909_v19 }
 0x90c   :  { %3188 = vpow2.f32 %v911_v22 }
 0x90f   :  { %v908_v23 = vpop.xlane.xlu1 %907 }
 0x910   :  { %v910_v24 = vsub.f32 %v897_v8, %v908_v23  ;;  %v3143_v8 = vld [vmem:[%s4025_s8 + $0x18] sm:$0xff]  }
 0x912   :  { %v913_v25 = vmul.f32 1.442695, %v910_v24 }
 0x913   :  { %v929_v26 = vpop.permute.xlu1 %928 }
 0x914   :  { %3190 = vpow2.f32 %v913_v25  ;;  %v934_v0 = vsel %vm267_vm3, %v929_v26, 0  ;;  %v2683_v26 = vld [vmem:[%s4021_s4] ss:$0 sm:$0xff] }
 0x915   :  { %2954 = vmatpush3.bf16.msra.mxu1 %v934_v0 }
 0x916   :  { %v3189_v27 = vpop.eup %3188  ;;  %2965 = vmatprep.subr.bf16.mxu1 %v3273_v10 }
 0x917   :  { %v915_v28 = vsel %vm142_vm2, %v3189_v27, 0.0 }
 0x918   :  { %916 = vadd.xlane.f32.xlu0 %v915_v28 }
 0x91e   :  { %v3191_v29 = vpop.eup %3190 }
 0x91f   :  { %v918_v53 = vsel %vm142_vm2, %v3191_v29, 0.0 }
 0x920   :  { %919 = vadd.xlane.f32.xlu0 %v918_v53 }
 0x936   :  { %977 = vrot.lane.b32.xlu0 %v3534_v60, %s3275_s16 }
 0x9a5   :  { %v917_v7 = vpop.xlane.xlu0 %916 }
 0x9a6   :  { %3192 = vrcp.f32 %v917_v7 }
 0x9ad   :  { %v920_v30 = vpop.xlane.xlu0 %919 }
 0x9ae   :  { %3194 = vrcp.f32 %v920_v30 }
 0x9b0   :  { %v3193_v31 = vpop.eup %3192 }
 0x9b1   :  { %v923_v32 = vmul.f32 %v3193_v31, %v3189_v27  ;;  %v978_v33 = vpop.permute.xlu0 %977 }
 0x9b2   :  { %v983_v34 = vsel %vm267_vm3, %v978_v33, 0  ;;  %v3147_v33 = vld [vmem:[%s4025_s8 + $0x38] sm:$0xff]  }
 0x9b3   :  { %1030 = vst.msk [vmem:[%s4032_s15 + $0x18] sm:$0xff] %vm142_vm2, %v923_v32  ;;  %2960 = vmatpush3.bf16.msra.mxu0 %v983_v34  ;;  %v925_v35 = vpack.c.bf16 %v923_v32, %v923_v32  ;;  %v3146_v32 = vld [vmem:[%s4025_s8 + $0x30] sm:$0xff]   ;;  %v2685_v34 = vld [vmem:[%s4024_s7] ss:$0 sm:$0xff] }
 0x9b4   :  { %2973 = vmatprep.subr.bf16.mxu0 %v3273_v10 }
 0x9b5   :  { %2956 = vmatmul.mubr.msk.bf16.vlgmr.msra.gmra.mrb[36].mxu1 %vm142_vm2, %v925_v35 }
 0x9b6   :  { %2969 = vmatprep.mubr.msk.bf16.mxu1 %vm3274_vm1, %v3273_v10 }
 0x9b8   :  { %v3195_v60 = vpop.eup %3194 }
 0x9b9   :  { %v924_v36 = vmul.f32 %v3195_v60, %v3191_v29  ;;  %v2684_v29 = vld [vmem:[%s4022_s5] ss:$0 sm:$0xff] }
 0x9bb   :  { %1034 = vst.msk [vmem:[%s4032_s15 + $0x38] sm:$0xff] %vm142_vm2, %v924_v36  ;;  %v926_v37 = vpack.c.bf16 %v924_v36, %v924_v36 }
 0x9bd   :  { %2962 = vmatmul.mubr.msk.bf16.vlgmr.msra.gmra.mrb[24].mxu0 %vm142_vm2, %v926_v37 }
 0x9be   :  { %2989 = vmatprep.mubr.msk.bf16.mxu0 %vm3274_vm1, %v3273_v10  ;;  %2974 = vmatpush3.bf16.msra.mxu0 %v3140_v1 }
 0x9bf   :  { %2975 = vmatprep.subr.bf16.mxu0 %v3273_v10 }
 0x9c2   :  { %2976 = vmatpush3.bf16.msra.mxu0 %v3141_v3 }
 0x9c3   :  { %2977 = vmatprep.subr.bf16.mxu0 %v3273_v10 }
 0x9c6   :  { %2978 = vmatpush3.bf16.msra.mxu0 %v3142_v4 }
 0x9c7   :  { %2979 = vmatprep.subr.bf16.mxu0 %v3273_v10 }
 0x9ca   :  { %2980 = vmatpush3.bf16.msra.mxu0 %v3143_v8 }
 0x9cb   :  { %2981 = vmatprep.subr.bf16.mxu0 %v3273_v10 }
 0x9ce   :  { %2982 = vmatpush3.bf16.msra.mxu0 %v3144_v13 }
 0x9cf   :  { %2983 = vmatprep.subr.bf16.mxu0 %v3273_v10 }
 0x9d2   :  { %2984 = vmatpush3.bf16.msra.mxu0 %v3145_v63 }
 0x9d3   :  { %2985 = vmatprep.subr.bf16.mxu0 %v3273_v10 }
 0x9d6   :  { %2986 = vmatpush3.bf16.msra.mxu0 %v3146_v32 }
 0x9d7   :  { %2987 = vmatprep.subr.bf16.mxu0 %v3273_v10 }
 0x9da   :  { %2988 = vmatpush3.bf16.msra.mxu0 %v3147_v33 }
 0x9db   :  { %3011 = vmatprep.subr.bf16.mxu0 %v3273_v10 }
 0xa88   :  { %v970_v38 = vpop.f32.mrb[36].mxu1 }
 0xa89   :  { %v1025_v18 = vadd.f32 %v970_v38, %v801_v12  ;;  %v2957_v39 = vpop.f32.mrb[37].mxu1 }
 0xa8a   :  { %v973_v40 = vpop.f32.mrb[38].mxu1 }
 0xa8b   :  { %v1035_v42 = vadd.f32 %v1025_v18, %v3383_v5  ;;  %v2958_v43 = vpop.f32.mrb[39].mxu1 }
 0xa8d   :  { %v1044_v44 = vadd.f32 %v2682_v41, %v1035_v42 }
 0xa8f   :  { %v1048_v21 = vsel %vm90_vm0, %v1044_v44, 0.0 }
 0xa90   :  { %v1019_v46 = vpop.f32.mrb[24].mxu0  ;;  %1049 = vadd.xlane.f32.xlu1 %v1048_v21 }
 0xa91   :  { %v1026_v47 = vadd.f32 %v1019_v46, %v3586_v58  ;;  %v2963_v48 = vpop.f32.mrb[25].mxu0 }
 0xa92   :  { %v1022_v49 = vpop.f32.mrb[26].mxu0 }
 0xa93   :  { %v1036_v50 = vadd.f32 %v1026_v47, %v3388_v6  ;;  %v2964_v51 = vpop.f32.mrb[27].mxu0  ;;  %v3138_v6 = vld [vmem:[%s4023_s6] sm:$0xff]  }
 0xa94   :  { %2966 = vmatpush3.bf16.msra.mxu1 %v3138_v6  ;;  %v3151_v6 = vld [vmem:[%s4018_s1 + $0x30] ss:$8 sps:$4 sm:$0xff]  }
 0xa95   :  { %v1045_v52 = vadd.f32 %v2682_v41, %v1036_v50  ;;  %2967 = vmatprep.subr.bf16.mxu1 %v3273_v10  ;;  %v2689_v41 = vld [vmem:[%s4026_s9] ss:$0 sm:$0xff] }
 0xa97   :  { %v1051_v12 = vsel %vm90_vm0, %v1045_v52, 0.0 }
 0xa98   :  { %1052 = vadd.xlane.f32.xlu0 %v1051_v12  ;;  %2968 = vmatpush3.bf16.msra.mxu1 %v3139_v62  ;;  %v3153_v62 = vld [vmem:[%s4018_s1 + $0x34] ss:$8 sps:$4 sm:$0xff]  }
 0xb1d   :  { %v1050_v54 = vpop.xlane.xlu1 %1049 }
 0xb1e   :  { %v1055_v55 = vmul.f32 0.03125, %v1050_v54 }
 0xb20   :  { %v1057_v5 = vsub.f32 %v1044_v44, %v1055_v55 }
 0xb22   :  { %v1059_v16 = vmul.f32 %v1057_v5, %v1057_v5 }
 0xb24   :  { %v1061_v56 = vsel %vm90_vm0, %v1059_v16, 0.0 }
 0xb25   :  { %v1053_v57 = vpop.xlane.xlu0 %1052  ;;  %1062 = vadd.xlane.f32.xlu1 %v1061_v56 }
 0xb26   :  { %v1056_v59 = vmul.f32 0.03125, %v1053_v57 }
 0xb28   :  { %v1058_v20 = vsub.f32 %v1045_v52, %v1056_v59 }
 0xb2a   :  { %v1060_v58 = vmul.f32 %v1058_v20, %v1058_v20 }
 0xb2c   :  { %v1064_v61 = vsel %vm90_vm0, %v1060_v58, 0.0  ;;  %v3150_v58 = vld [vmem:[%s4018_s1 + $0x24] ss:$8 sps:$4 sm:$0xff]  }
 0xb2d   :  { %1065 = vadd.xlane.f32.xlu0 %v1064_v61  ;;  %v3148_v61 = vld [vmem:[%s4018_s1 + $0x20] ss:$8 sps:$4 sm:$0xff]   ;;  %1362 = vmatprep.subr.bf16.mxu1 %v3150_v58 }
 0xbb2   :  { %v1063_v15 = vpop.xlane.xlu1 %1062 }
 0xbb3   :  { %v1067_v17 = vmul.f32 0.03125, %v1063_v15 }
 0xbb5   :  { %v1069_v14 = vadd.f32 1e-05, %v1067_v17  ;;  %v2698_v17 = vld [vmem:[%s4027_s10] ss:$0 sm:$0xff] }
 0xbb7   :  { %3196 = vrsqrt.f32 %v1069_v14 }
 0xbba   :  { %v1066_v19 = vpop.xlane.xlu0 %1065 }
 0xbbb   :  { %v1068_v22 = vmul.f32 0.03125, %v1066_v19 }
 0xbbd   :  { %v1070_v23 = vadd.f32 1e-05, %v1068_v22 }
 0xbbf   :  { %3198 = vrsqrt.f32 %v1070_v23 }
 0xbc1   :  { %v3197_v24 = vpop.eup %3196 }
 0xbc2   :  { %v1073_v25 = vmul.f32 %v3197_v24, %v1057_v5  ;;  %v2699_v24 = vld [vmem:[%s4028_s11] ss:$0 sm:$0xff] }
 0xbc4   :  { %v1081_v27 = vmul.f32 %v2683_v26, %v1073_v25 }
 0xbc6   :  { %v1089_v7 = vadd.f32 %v2684_v29, %v1081_v27 }
 0xbc9   :  { %v3199_v0 = vpop.eup %3198 }
 0xbca   :  { %v1074_v28 = vmul.f32 %v3199_v0, %v1058_v20 }
 0xbcc   :  { %v1082_v53 = vmul.f32 %v2683_v26, %v1074_v28  ;;  %v3714_v28 = vld [vmem:[%s4019_s2 + $0x2] sm:$0x3] }
 0xbce   :  { %v1090_v30 = vadd.f32 %v2684_v29, %v1082_v53  ;;  %v1332_v29 = vrot.slane %v3714_v28, %v62_v11 }
 0xbd0   :  { %v1091_v31 = vpack.c.bf16 %v1090_v30, %v1089_v7 }
 0xbd2   :  { %2970 = vmatmul.mubr.msk.bf16.vlgmr.msra.gmra.mrb[40].mxu1 %vm90_vm0, %v1091_v31 }
 0xbd3   :  { %1394 = vmatprep.mubr.bf16.mxu1 %v3272_v2  ;;  %1363 = vmatpush1.bf16.msra.mxu1 %v3148_v61 }
 0xbd4   :  { %1364 = vmatprep.subr.bf16.mxu1 %v3153_v62 }
 0xbd7   :  { %1365 = vmatpush1.bf16.msra.mxu1 %v3151_v6 }
 0xbd8   :  { %2993 = vmatprep.subr.bf16.mxu1 %v3273_v10 }
 0xca5   :  { %v1152_v35 = vpop.f32.mrb[40].mxu1 }
 0xca6   :  { %v1153_v2 = vadd.f32 %v2685_v34, %v1152_v35  ;;  %v2971_v60 = vpop.f32.mrb[41].mxu1 }
 0xca7   :  { %v1155_v36 = vpop.f32.mrb[42].mxu1 }
 0xca8   :  { %v1156_v37 = vadd.f32 %v2685_v34, %v1155_v36  ;;  %v2972_v38 = vpop.f32.mrb[43].mxu1  ;;  %v1159_v18 = vmax.f32 %v1153_v2, 0.0 }
 0xcaa   :  { %v1160_v39 = vmax.f32 %v1156_v37, 0.0 }
 0xcac   :  { %v1161_v40 = vpack.c.bf16 %v1160_v39, %v1159_v18 }
 0xcae   :  { %2990 = vmatmul.mubr.bf16.vlgmr.msra.gmra.mrb[28].mxu0 %v1161_v40 }
 0xcaf   :  { %3013 = vmatprep.mubr.msk.bf16.mxu0 %vm3274_vm1, %v3273_v10 }
 0xd81   :  { %v1267_v42 = vpop.f32.mrb[28].mxu0 }
 0xd82   :  { %v1268_v43 = vadd.f32 %v2689_v41, %v1267_v42  ;;  %v2991_v44 = vpop.f32.mrb[29].mxu0 }
 0xd83   :  { %v1270_v21 = vpop.f32.mrb[30].mxu0 }
 0xd84   :  { %v1271_v46 = vadd.f32 %v2689_v41, %v1270_v21  ;;  %v2992_v47 = vpop.f32.mrb[31].mxu0  ;;  %v1274_v48 = vadd.f32 %v1268_v43, %v1089_v7 }
 0xd86   :  { %v1278_v49 = vsel %vm90_vm0, %v1274_v48, 0.0  ;;  %v1275_v50 = vadd.f32 %v1271_v46, %v1090_v30 }
 0xd87   :  { %1279 = vadd.xlane.f32.xlu1 %v1278_v49 }
 0xd88   :  { %v1281_v51 = vsel %vm90_vm0, %v1275_v50, 0.0 }
 0xd89   :  { %1282 = vadd.xlane.f32.xlu0 %v1281_v51 }
 0xe14   :  { %v1280_v52 = vpop.xlane.xlu1 %1279 }
 0xe15   :  { %v1284_v12 = vmul.f32 0.03125, %v1280_v52 }
 0xe16   :  { %v1283_v54 = vpop.xlane.xlu0 %1282 }
 0xe17   :  { %v1286_v55 = vsub.f32 %v1274_v48, %v1284_v12  ;;  %v1285_v5 = vmul.f32 0.03125, %v1283_v54 }
 0xe19   :  { %v1287_v16 = vsub.f32 %v1275_v50, %v1285_v5  ;;  %v1288_v56 = vmul.f32 %v1286_v55, %v1286_v55 }
 0xe1b   :  { %v1290_v57 = vsel %vm90_vm0, %v1288_v56, 0.0  ;;  %v1289_v59 = vmul.f32 %v1287_v16, %v1287_v16 }
 0xe1c   :  { %1291 = vadd.xlane.f32.xlu1 %v1290_v57 }
 0xe1d   :  { %v1293_v20 = vsel %vm90_vm0, %v1289_v59, 0.0 }
 0xe1e   :  { %1294 = vadd.xlane.f32.xlu0 %v1293_v20 }
 0xea9   :  { %v1292_v1 = vpop.xlane.xlu1 %1291 }
 0xeaa   :  { %v1296_v3 = vmul.f32 0.03125, %v1292_v1 }
 0xeab   :  { %v1295_v4 = vpop.xlane.xlu0 %1294 }
 0xeac   :  { %v1298_v8 = vadd.f32 1e-05, %v1296_v3  ;;  %v1297_v13 = vmul.f32 0.03125, %v1295_v4 }
 0xeae   :  { %3200 = vrsqrt.f32 %v1298_v8  ;;  %v1299_v63 = vadd.f32 1e-05, %v1297_v13 }
 0xeb0   :  { %3202 = vrsqrt.f32 %v1299_v63 }
 0xeb8   :  { %v3201_v15 = vpop.eup %3200 }
 0xeb9   :  { %v1302_v14 = vmul.f32 %v3201_v15, %v1286_v55 }
 0xeba   :  { %v3203_v19 = vpop.eup %3202 }
 0xebb   :  { %v1310_v22 = vmul.f32 %v2698_v17, %v1302_v14  ;;  %v1303_v23 = vmul.f32 %v3203_v19, %v1287_v16 }
 0xebd   :  { %v1311_v25 = vmul.f32 %v2698_v17, %v1303_v23  ;;  %v3702_v26 = vadd.f32 %v2699_v24, %v1310_v22 }
 0xebf   :  { %v3704_v0 = vadd.f32 %v2699_v24, %v1311_v25 }
 0xec1   :  { %v1320_v27 = vpack.c.bf16 %v3704_v0, %v3702_v26 }
 0xec3   :  { %2709 = vmatmul.mubr.msk.bf16.vlgmr.msra.gmra.mrb[44].mxu1 %vm90_vm0, %v1320_v27 }
 0xec4   :  { %2995 = vmatprep.mubr.msk.bf16.mxu1 %vm3274_vm1, %v3273_v10 }
 0xf96   :  { %v1396_v53 = vpop.f32.mrb[44].mxu1 }
 0xf97   :  { %v1397_v7 = vadd.f32 %v1396_v53, %v1332_v29  ;;  %v3719_v30 = vpop.f32.mrb[45].mxu1 }
 0xf98   :  { %v1400_v31 = vpop.f32.mrb[46].mxu1 }
 0xf99   :  { %v3721_v32 = vpack.c.bf16 %v1397_v7, %v1397_v7  ;;  %v1401_v33 = vadd.f32 %v1400_v31, %v1332_v29  ;;  %v3723_v34 = vpop.f32.mrb[47].mxu1 }
 0xf9b   :  { %v3725_v35 = vpack.c.bf16 %v1401_v33, %v1401_v33  ;;  %1408 = vrot.lane.b32.xlu1 %v3721_v32, %s3275_s16 }
 0xf9d   :  { %1457 = vrot.lane.b32.xlu0 %v3725_v35, %s3275_s16 }
0x100d   :  { %v1409_v2 = vpop.permute.xlu1 %1408 }
0x100e   :  { %v1414_v11 = vsel %vm142_vm2, %v1409_v2, 0 }
0x100f   :  { %2994 = vmatpush3.bf16.xpose.msra.mxu1 %v1414_v11  ;;  %v1458_v60 = vpop.permute.xlu0 %1457 }
0x1010   :  { %2999 = vmatprep.subr.bf16.mxu1 %v3273_v10  ;;  %v1463_v36 = vsel %vm142_vm2, %v1458_v60, 0 }
0x1016   :  { %2996 = vmatmul.mubr.msk.bf16.vlgmr.msra.gmra.mrb[48].mxu1 %vm142_vm2, %v3721_v32 }
0x1017   :  { %3000 = vmatpush3.bf16.xpose.msra.mxu1 %v1463_v36  ;;  %3001 = vmatprep.mubr.msk.bf16.mxu1 %vm3274_vm1, %v3273_v10 }
0x1018   :  { %3005 = vmatprep.subr.bf16.mxu1 %v3273_v10 }
0x101e   :  { %3002 = vmatmul.mubr.msk.bf16.vlgmr.msra.gmra.mrb[52].mxu1 %vm142_vm2, %v3725_v35 }
0x101f   :  { %3007 = vmatprep.mubr.msk.bf16.mxu1 %vm3274_vm1, %v3273_v10 }
0x10e9   :  { %v1450_v37 = vpop.f32.mrb[48].mxu1 }
0x10ea   :  { %v2997_v38 = vpop.f32.mrb[49].mxu1  ;;  %v1505_v18 = vsel %vm142_vm2, %v1450_v37, -inf }
0x10eb   :  { %1506 = vmax.xlane.f32.xlu1 %v1505_v18  ;;  %v1453_v39 = vpop.f32.mrb[50].mxu1 }
0x10ec   :  { %v2998_v40 = vpop.f32.mrb[51].mxu1 }
0x10f1   :  { %v1499_v41 = vpop.f32.mrb[52].mxu1 }
0x10f2   :  { %v3003_v42 = vpop.f32.mrb[53].mxu1  ;;  %v1508_v43 = vsel %vm142_vm2, %v1499_v41, -inf }
0x10f3   :  { %1509 = vmax.xlane.f32.xlu0 %v1508_v43  ;;  %v1502_v44 = vpop.f32.mrb[54].mxu1 }
0x10f4   :  { %v3004_v21 = vpop.f32.mrb[55].mxu1 }
0x10fc   :  { %1529 = vrot.lane.b32.xlu1 %v3721_v32, %s3276_s17 }
0x1178   :  { %v1507_v46 = vpop.xlane.xlu1 %1506 }
0x1179   :  { %v1511_v47 = vsub.f32 %v1450_v37, %v1507_v46 }
0x117b   :  { %v1513_v48 = vmul.f32 1.442695, %v1511_v47 }
0x117c   :  { %v1530_v49 = vpop.permute.xlu1 %1529 }
0x117d   :  { %3204 = vpow2.f32 %v1513_v48  ;;  %v1535_v50 = vsel %vm267_vm3, %v1530_v49, 0 }
0x117e   :  { %3006 = vmatpush3.bf16.msra.mxu1 %v1535_v50 }
0x117f   :  { %3017 = vmatprep.subr.bf16.mxu1 %v3273_v10 }
0x1180   :  { %v1510_v51 = vpop.xlane.xlu0 %1509 }
0x1181   :  { %v1512_v52 = vsub.f32 %v1499_v41, %v1510_v51 }
0x1183   :  { %v1515_v12 = vmul.f32 1.442695, %v1512_v52 }
0x1185   :  { %3206 = vpow2.f32 %v1515_v12  ;;  %v1336_v12 = vrot.slane %v3714_v28, %v66_v45 }
0x1187   :  { %v3205_v54 = vpop.eup %3204 }
0x1188   :  { %v1517_v55 = vsel %vm142_vm2, %v3205_v54, 0.0 }
0x1189   :  { %1518 = vadd.xlane.f32.xlu1 %v1517_v55 }
0x118f   :  { %v3207_v5 = vpop.eup %3206 }
0x1190   :  { %v1520_v16 = vsel %vm142_vm2, %v3207_v5, 0.0 }
0x1191   :  { %1521 = vadd.xlane.f32.xlu0 %v1520_v16 }
0x119a   :  { %1629 = vrot.lane.b32.xlu1 %v3721_v32, %s3277_s18 }
0x119e   :  { %1679 = vrot.lane.b32.xlu1 %v3725_v35, %s3277_s18 }
0x11a2   :  { %1677 = vrot.lane.b32.xlu1 %v3725_v35, %s3278_s19 }
0x11a7   :  { %1577 = vrot.lane.b32.xlu0 %v3725_v35, %s3276_s17 }
0x11ab   :  { %1627 = vrot.lane.b32.xlu0 %v3721_v32, %s3278_s19 }
0x1216   :  { %v1519_v56 = vpop.xlane.xlu1 %1518 }
0x1217   :  { %3208 = vrcp.f32 %v1519_v56 }
0x121a   :  { %v1630_v61 = vpop.permute.xlu1 %1629 }
0x121b   :  { %v1635_v1 = vsel %vm142_vm2, %v1630_v61, 0 }
0x121e   :  { %v1522_v57 = vpop.xlane.xlu0 %1521  ;;  %v1680_v8 = vpop.permute.xlu1 %1679 }
0x121f   :  { %3210 = vrcp.f32 %v1522_v57  ;;  %v1685_v15 = vsel %vm142_vm2, %v1680_v8, 0  ;;  %v1399_v57 = vadd.f32 %v3719_v30, %v1336_v12 }
0x1221   :  { %v3209_v59 = vpop.eup %3208  ;;  %v3824_v28 = vpack.c.bf16 %v1399_v57, %v1399_v57 }
0x1222   :  { %v1525_v20 = vmul.f32 %v3209_v59, %v3205_v54  ;;  %v1578_v58 = vpop.permute.xlu0 %1577  ;;  %v1678_v17 = vpop.permute.xlu1 %1677 }
0x1223   :  { %v1583_v6 = vsel %vm267_vm3, %v1578_v58, 0  ;;  %v1979_v61 = vsel %vm267_vm3, %v3824_v28, 0 }
0x1224   :  { %2726 = vst.msk [vmem:[%s4032_s15 + $0x40] sm:$0xff] %vm142_vm2, %v1525_v20  ;;  %3012 = vmatpush3.bf16.msra.mxu0 %v1583_v6  ;;  %v1527_v62 = vpack.c.bf16 %v1525_v20, %v1525_v20  ;;  %v1403_v6 = vadd.f32 %v3723_v34, %v1336_v12 }
0x1225   :  { %3023 = vmatprep.subr.bf16.mxu0 %v3273_v10 }
0x1226   :  { %3008 = vmatmul.mubr.msk.bf16.vlgmr.msra.gmra.mrb[56].mxu1 %vm142_vm2, %v1527_v62  ;;  %v1628_v63 = vpop.permute.xlu0 %1627 }
0x1227   :  { %3018 = vmatpush3.bf16.xpose.msra.mxu1 %v1635_v1  ;;  %3019 = vmatprep.mubr.msk.bf16.mxu1 %vm3274_vm1, %v3273_v10  ;;  %v3842_v1 = vpack.c.bf16 %v1403_v6, %v1403_v6 }
0x1228   :  { %3029 = vmatprep.subr.bf16.mxu1 %v3273_v10 }
0x1229   :  { %v3211_v3 = vpop.eup %3210 }
0x122a   :  { %v1526_v4 = vmul.f32 %v3211_v3, %v3207_v5  ;;  %v2025_v3 = vsel %vm267_vm3, %v3842_v1, 0 }
0x122c   :  { %2730 = vst.msk [vmem:[%s4032_s15 + $0x60] sm:$0xff] %vm142_vm2, %v1526_v4  ;;  %v1528_v13 = vpack.c.bf16 %v1526_v4, %v1526_v4 }
0x122e   :  { %3014 = vmatmul.mubr.msk.bf16.vlgmr.msra.gmra.mrb[32].mxu0 %vm142_vm2, %v1528_v13  ;;  %3020 = vmatmul.mubr.msk.bf16.vlgmr.msra.gmra.mrb[60].mxu1 %vm142_vm2, %v1628_v63 }
0x122f   :  { %3024 = vmatpush3.bf16.xpose.msra.mxu0 %v1685_v15  ;;  %3025 = vmatprep.mubr.msk.bf16.mxu0 %vm3274_vm1, %v3273_v10 }
0x1230   :  { %3035 = vmatprep.subr.bf16.mxu0 %v3273_v10  ;;  %3031 = vmatprep.mubr.msk.bf16.mxu1 %vm3274_vm1, %v3273_v10 }
0x1236   :  { %3026 = vmatmul.mubr.msk.bf16.vlgmr.msra.gmra.mrb[36].mxu0 %vm142_vm2, %v1678_v17 }
0x1237   :  { %3037 = vmatprep.mubr.msk.bf16.mxu0 %vm3274_vm1, %v3273_v10 }
0x12f9   :  { %v3787_v14 = vpop.f32.mrb[56].mxu1 }
0x12fa   :  { %v3009_v19 = vpop.f32.mrb[57].mxu1 }
0x12fb   :  { %v1574_v22 = vpop.f32.mrb[58].mxu1 }
0x12fc   :  { %v3010_v23 = vpop.f32.mrb[59].mxu1 }
0x1301   :  { %v3789_v24 = vpop.f32.mrb[32].mxu0  ;;  %v1671_v25 = vpop.f32.mrb[60].mxu1 }
0x1302   :  { %v3015_v27 = vpop.f32.mrb[33].mxu0  ;;  %v3021_v29 = vpop.f32.mrb[61].mxu1  ;;  %v1727_v53 = vsel %vm142_vm2, %v1671_v25, -inf }
0x1303   :  { %v1622_v7 = vpop.f32.mrb[34].mxu0  ;;  %1728 = vmax.xlane.f32.xlu0 %v1727_v53  ;;  %v1674_v31 = vpop.f32.mrb[62].mxu1 }
0x1304   :  { %v3016_v33 = vpop.f32.mrb[35].mxu0  ;;  %v3022_v2 = vpop.f32.mrb[63].mxu1 }
0x1309   :  { %v1721_v11 = vpop.f32.mrb[36].mxu0 }
0x130a   :  { %v3027_v60 = vpop.f32.mrb[37].mxu0  ;;  %v1730_v36 = vsel %vm142_vm2, %v1721_v11, -inf }
0x130b   :  { %1731 = vmax.xlane.f32.xlu1 %v1730_v36  ;;  %v1724_v37 = vpop.f32.mrb[38].mxu0 }
0x130c   :  { %v3028_v38 = vpop.f32.mrb[39].mxu0 }
0x131c   :  { %1751 = vrot.lane.b32.xlu1 %v3721_v32, %s3279_s24 }
0x1320   :  { %1853 = vrot.lane.b32.xlu1 %v3721_v32, %s3280_s25 }
0x1324   :  { %1903 = vrot.lane.b32.xlu1 %v3725_v35, %s3280_s25 }
0x1328   :  { %1901 = vrot.lane.b32.xlu1 %v3725_v35, %s3281_s26 }
0x1390   :  { %v1729_v18 = vpop.xlane.xlu0 %1728 }
0x1391   :  { %v1733_v39 = vsub.f32 %v1671_v25, %v1729_v18 }
0x1393   :  { %v1735_v40 = vmul.f32 1.442695, %v1733_v39 }
0x1395   :  { %3212 = vpow2.f32 %v1735_v40 }
0x1398   :  { %v1732_v41 = vpop.xlane.xlu1 %1731 }
0x1399   :  { %v1734_v42 = vsub.f32 %v1721_v11, %v1732_v41 }
0x139b   :  { %v1737_v43 = vmul.f32 1.442695, %v1734_v42 }
0x139c   :  { %v1752_v44 = vpop.permute.xlu1 %1751 }
0x139d   :  { %3214 = vpow2.f32 %v1737_v43  ;;  %v1757_v21 = vsel %vm267_vm3, %v1752_v44, 0 }
0x139e   :  { %3030 = vmatpush3.bf16.msra.mxu1 %v1757_v21 }
0x139f   :  { %v3213_v46 = vpop.eup %3212  ;;  %3041 = vmatprep.subr.bf16.mxu1 %v3273_v10 }
0x13a0   :  { %v1739_v47 = vsel %vm142_vm2, %v3213_v46, 0.0  ;;  %v1854_v5 = vpop.permute.xlu1 %1853 }
0x13a1   :  { %1740 = vadd.xlane.f32.xlu0 %v1739_v47  ;;  %v1859_v9 = vsel %vm142_vm2, %v1854_v5, 0 }
0x13a4   :  { %v1904_v20 = vpop.permute.xlu1 %1903 }
0x13a5   :  { %v1909_v62 = vsel %vm142_vm2, %v1904_v20, 0 }
0x13a7   :  { %v3215_v48 = vpop.eup %3214 }
0x13a8   :  { %v1742_v49 = vsel %vm142_vm2, %v3215_v48, 0.0  ;;  %v1902_v34 = vpop.permute.xlu1 %1901 }
0x13a9   :  { %1743 = vadd.xlane.f32.xlu0 %v1742_v49 }
0x13bf   :  { %1799 = vrot.lane.b32.xlu0 %v3725_v35, %s3279_s24 }
0x13c3   :  { %1851 = vrot.lane.b32.xlu0 %v3721_v32, %s3281_s26 }
0x142e   :  { %v1741_v50 = vpop.xlane.xlu0 %1740 }
0x142f   :  { %3216 = vrcp.f32 %v1741_v50 }
0x1436   :  { %v1744_v51 = vpop.xlane.xlu0 %1743 }
0x1437   :  { %3218 = vrcp.f32 %v1744_v51 }
0x1439   :  { %v3217_v52 = vpop.eup %3216 }
0x143a   :  { %v1747_v54 = vmul.f32 %v3217_v52, %v3213_v46  ;;  %v1800_v55 = vpop.permute.xlu0 %1799 }
0x143b   :  { %v1805_v16 = vsel %vm267_vm3, %v1800_v55, 0 }
0x143c   :  { %2727 = vst.msk [vmem:[%s4032_s15 + $0x48] sm:$0xff] %vm142_vm2, %v1747_v54  ;;  %3036 = vmatpush3.bf16.msra.mxu0 %v1805_v16  ;;  %v1749_v56 = vpack.c.bf16 %v1747_v54, %v1747_v54 }
0x143d   :  { %3047 = vmatprep.subr.bf16.mxu0 %v3273_v10 }
0x143e   :  { %3032 = vmatmul.mubr.msk.bf16.vlgmr.msra.gmra.mrb[64].mxu1 %vm142_vm2, %v1749_v56  ;;  %v1852_v58 = vpop.permute.xlu0 %1851 }
0x143f   :  { %3042 = vmatpush3.bf16.xpose.msra.mxu1 %v1859_v9  ;;  %3043 = vmatprep.mubr.msk.bf16.mxu1 %vm3274_vm1, %v3273_v10 }
0x1440   :  { %3053 = vmatprep.subr.bf16.mxu1 %v3273_v10 }
0x1441   :  { %v3219_v45 = vpop.eup %3218 }
0x1442   :  { %v1748_v59 = vmul.f32 %v3219_v45, %v3215_v48 }
0x1444   :  { %2731 = vst.msk [vmem:[%s4032_s15 + $0x68] sm:$0xff] %vm142_vm2, %v1748_v59  ;;  %v1750_v30 = vpack.c.bf16 %v1748_v59, %v1748_v59 }
0x1446   :  { %3038 = vmatmul.mubr.msk.bf16.vlgmr.msra.gmra.mrb[40].mxu0 %vm142_vm2, %v1750_v30  ;;  %3044 = vmatmul.mubr.msk.bf16.vlgmr.msra.gmra.mrb[68].mxu1 %vm142_vm2, %v1852_v58 }
0x1447   :  { %3048 = vmatpush3.bf16.xpose.msra.mxu0 %v1909_v62  ;;  %3054 = vmatpush3.bf16.msra.mxu1 %v1979_v61 }
0x1448   :  { %3049 = vmatprep.mubr.msk.bf16.mxu0 %vm3274_vm1, %v3273_v10  ;;  %3059 = vmatprep.subr.bf16.mxu0 %v3273_v10 }
0x1449   :  { %3055 = vmatprep.mubr.msk.bf16.mxu1 %vm3274_vm1, %v3273_v10  ;;  %3065 = vmatprep.subr.bf16.mxu1 %v3273_v10 }
0x144e   :  { %3050 = vmatmul.mubr.msk.bf16.vlgmr.msra.gmra.mrb[44].mxu0 %vm142_vm2, %v1902_v34 }
0x144f   :  { %3060 = vmatpush3.bf16.msra.mxu0 %v2025_v3  ;;  %3061 = vmatprep.mubr.msk.bf16.mxu0 %vm3274_vm1, %v3273_v10 }
0x1450   :  { %3071 = vmatprep.subr.bf16.mxu0 %v3273_v10 }
0x1511   :  { %v1793_v4 = vpop.f32.mrb[64].mxu1 }
0x1512   :  { %v3851_v8 = vadd.f32 %v1793_v4, %v3787_v14  ;;  %v3033_v13 = vpop.f32.mrb[65].mxu1 }
0x1513   :  { %v1796_v63 = vpop.f32.mrb[66].mxu1 }
0x1514   :  { %v3034_v15 = vpop.f32.mrb[67].mxu1 }
0x1519   :  { %v1841_v17 = vpop.f32.mrb[40].mxu0  ;;  %v1895_v19 = vpop.f32.mrb[68].mxu1 }
0x151a   :  { %v3854_v22 = vadd.f32 %v1841_v17, %v3789_v24  ;;  %v3039_v23 = vpop.f32.mrb[41].mxu0  ;;  %v3045_v25 = vpop.f32.mrb[69].mxu1  ;;  %v1951_v27 = vsel %vm142_vm2, %v1895_v19, -inf }
0x151b   :  { %v1844_v29 = vpop.f32.mrb[42].mxu0  ;;  %1952 = vmax.xlane.f32.xlu0 %v1951_v27  ;;  %v1898_v53 = vpop.f32.mrb[70].mxu1 }
0x151c   :  { %v3040_v7 = vpop.f32.mrb[43].mxu0  ;;  %v3046_v31 = vpop.f32.mrb[71].mxu1 }
0x1521   :  { %v1945_v33 = vpop.f32.mrb[44].mxu0 }
0x1522   :  { %v3051_v14 = vpop.f32.mrb[45].mxu0  ;;  %v1954_v2 = vsel %vm142_vm2, %v1945_v33, -inf }
0x1523   :  { %1955 = vmax.xlane.f32.xlu1 %v1954_v2  ;;  %v1948_v11 = vpop.f32.mrb[46].mxu0 }
0x1524   :  { %v3052_v60 = vpop.f32.mrb[47].mxu0 }
0x1534   :  { %2071 = vrot.lane.b32.xlu1 %v3721_v32, %s3282_s30 }
0x1538   :  { %2069 = vrot.lane.b32.xlu1 %v3721_v32, %s4035_s29 }
0x153c   :  { %2119 = vrot.lane.b32.xlu1 %v3725_v35, %s4035_s29  ;;  %s2646_s29 = sshll.u32 %s3284_s28, 4  ;;  %s2647_s29 = int_to_ptr.vmem [resolvable:$true] %s2646_s29 }
0x153d   :  { %p3253_p1 = scmp.lt.s32.totalorder %s2647_s29, %s2647_s29 }
0x15a8   :  { %v1953_v24 = vpop.xlane.xlu0 %1952 }
0x15a9   :  { %v1957_v36 = vsub.f32 %v1895_v19, %v1953_v24 }
0x15ab   :  { %v1959_v37 = vmul.f32 1.442695, %v1957_v36 }
0x15ad   :  { %3220 = vpow2.f32 %v1959_v37 }
0x15b0   :  { %v1956_v38 = vpop.xlane.xlu1 %1955 }
0x15b1   :  { %v1958_v18 = vsub.f32 %v1945_v33, %v1956_v38 }
0x15b3   :  { %v1961_v39 = vmul.f32 1.442695, %v1958_v18 }
0x15b4   :  { %v2072_v47 = vpop.permute.xlu1 %2071 }
0x15b5   :  { %3222 = vpow2.f32 %v1961_v39  ;;  %v2077_v49 = vsel %vm142_vm2, %v2072_v47, 0 }
0x15b7   :  { %v3221_v40 = vpop.eup %3220 }
0x15b8   :  { %v1963_v41 = vsel %vm142_vm2, %v3221_v40, 0.0  ;;  %v2070_v12 = vpop.permute.xlu1 %2069 }
0x15b9   :  { %1964 = vadd.xlane.f32.xlu0 %v1963_v41 }
0x15bc   :  { %v2120_v55 = vpop.permute.xlu1 %2119 }
0x15bf   :  { %v3223_v42 = vpop.eup %3222 }
0x15c0   :  { %v1966_v43 = vsel %vm142_vm2, %v3223_v42, 0.0 }
0x15c1   :  { %1967 = vadd.xlane.f32.xlu0 %v1966_v43  ;;  %v2735_v43 = vld [vmem:[%s4020_s3 + $0x1] ss:$0 sm:$0xff] }
0x15d7   :  { %2121 = vrot.lane.b32.xlu0 %v3725_v35, %s3282_s30 }
0x1646   :  { %v1965_v32 = vpop.xlane.xlu0 %1964 }
0x1647   :  { %3224 = vrcp.f32 %v1965_v32 }
0x164e   :  { %v1968_v44 = vpop.xlane.xlu0 %1967 }
0x164f   :  { %3226 = vrcp.f32 %v1968_v44 }
0x1651   :  { %v3225_v21 = vpop.eup %3224 }
0x1652   :  { %v1971_v46 = vmul.f32 %v3225_v21, %v3221_v40  ;;  %v2122_v51 = vpop.permute.xlu0 %2121 }
0x1653   :  { %v2127_v54 = vsel %vm142_vm2, %v2122_v51, 0 }
0x1654   :  { %2728 = vst.msk [vmem:[%s4032_s15 + $0x50] sm:$0xff] %vm142_vm2, %v1971_v46  ;;  %v1973_v48 = vpack.c.bf16 %v1971_v46, %v1971_v46 }
0x1656   :  { %3056 = vmatmul.mubr.msk.bf16.vlgmr.msra.gmra.mrb[72].mxu1 %vm142_vm2, %v1973_v48 }
0x1657   :  { %3066 = vmatpush3.bf16.xpose.msra.mxu1 %v2077_v49  ;;  %3067 = vmatprep.mubr.msk.bf16.mxu1 %vm3274_vm1, %v3273_v10 }
0x1658   :  { %3077 = vmatprep.subr.bf16.mxu1 %v3273_v10 }
0x1659   :  { %v3227_v35 = vpop.eup %3226 }
0x165a   :  { %v1972_v50 = vmul.f32 %v3227_v35, %v3223_v42 }
0x165c   :  { %2732 = vst.msk [vmem:[%s4032_s15 + $0x70] sm:$0xff] %vm142_vm2, %v1972_v50  ;;  %v1974_v52 = vpack.c.bf16 %v1972_v50, %v1972_v50 }
0x165e   :  { %3062 = vmatmul.mubr.msk.bf16.vlgmr.msra.gmra.mrb[48].mxu0 %vm142_vm2, %v1974_v52  ;;  %3068 = vmatmul.mubr.msk.bf16.vlgmr.msra.gmra.mrb[76].mxu1 %vm142_vm2, %v2070_v12 }
0x165f   :  { %3072 = vmatpush3.bf16.xpose.msra.mxu0 %v2127_v54  ;;  %3073 = vmatprep.mubr.msk.bf16.mxu0 %vm3274_vm1, %v3273_v10 }
0x1660   :  { %3083 = vmatprep.subr.bf16.mxu0 %v3273_v10  ;;  %3079 = vmatprep.mubr.msk.bf16.mxu1 %vm3274_vm1, %v3273_v10 }
0x1666   :  { %3074 = vmatmul.mubr.msk.bf16.vlgmr.msra.gmra.mrb[52].mxu0 %vm142_vm2, %v2120_v55 }
0x1667   :  { %3085 = vmatprep.mubr.msk.bf16.mxu0 %vm3274_vm1, %v3273_v10 }
0x1729   :  { %v2015_v5 = vpop.f32.mrb[72].mxu1 }
0x172a   :  { %v2067_v16 = vadd.f32 %v2015_v5, %v3851_v8  ;;  %v3057_v56 = vpop.f32.mrb[73].mxu1 }
0x172b   :  { %v2018_v57 = vpop.f32.mrb[74].mxu1 }
0x172c   :  { %v3058_v9 = vpop.f32.mrb[75].mxu1 }
0x1731   :  { %v2061_v45 = vpop.f32.mrb[48].mxu0  ;;  %v2113_v59 = vpop.f32.mrb[76].mxu1 }
0x1732   :  { %v3894_v20 = vadd.f32 %v2061_v45, %v3854_v22  ;;  %v3063_v30 = vpop.f32.mrb[49].mxu0  ;;  %v3069_v58 = vpop.f32.mrb[77].mxu1  ;;  %v2169_v61 = vsel %vm142_vm2, %v2113_v59, -inf }
0x1733   :  { %v2064_v6 = vpop.f32.mrb[50].mxu0  ;;  %2170 = vmax.xlane.f32.xlu0 %v2169_v61  ;;  %v2116_v62 = vpop.f32.mrb[78].mxu1  ;;  %v3156_v30 = vld [vmem:[%s4025_s8 + $0x40] sm:$0xff]   ;;  %v3157_v58 = vld [vmem:[%s4025_s8 + $0x48] sm:$0xff]   ;;  %v3158_v61 = vld [vmem:[%s4025_s8 + $0x50] sm:$0xff]  }
0x1734   :  { %v3064_v34 = vpop.f32.mrb[51].mxu0  ;;  %v3070_v3 = vpop.f32.mrb[79].mxu1  ;;  %v3159_v6 = vld [vmem:[%s4025_s8 + $0x58] sm:$0xff]   ;;  %v3160_v62 = vld [vmem:[%s4025_s8 + $0x60] sm:$0xff]  }
0x1735   :  { %v3161_v34 = vld [vmem:[%s4025_s8 + $0x68] sm:$0xff]  }
0x1739   :  { %v2163_v4 = vpop.f32.mrb[52].mxu0 }
0x173a   :  { %v3075_v13 = vpop.f32.mrb[53].mxu0  ;;  %v2172_v8 = vsel %vm142_vm2, %v2163_v4, -inf }
0x173b   :  { %2173 = vmax.xlane.f32.xlu1 %v2172_v8  ;;  %v2166_v63 = vpop.f32.mrb[54].mxu0 }
0x173c   :  { %v3076_v15 = vpop.f32.mrb[55].mxu0 }
0x174c   :  { %2194 = vrot.lane.b32.xlu1 %v3824_v28, %s3275_s16 }
0x17c0   :  { %v2171_v17 = vpop.xlane.xlu0 %2170 }
0x17c1   :  { %v2175_v19 = vsub.f32 %v2113_v59, %v2171_v17 }
0x17c3   :  { %v2177_v22 = vmul.f32 1.442695, %v2175_v19 }
0x17c5   :  { %3228 = vpow2.f32 %v2177_v22  ;;  %v2738_v22 = vld [vmem:[%s4021_s4 + $0x1] ss:$0 sm:$0xff] }
0x17c8   :  { %v2174_v23 = vpop.xlane.xlu1 %2173 }
0x17c9   :  { %v2176_v25 = vsub.f32 %v2163_v4, %v2174_v23 }
0x17cb   :  { %v2179_v27 = vmul.f32 1.442695, %v2176_v25 }
0x17cc   :  { %v2195_v29 = vpop.permute.xlu1 %2194 }
0x17cd   :  { %3230 = vpow2.f32 %v2179_v27  ;;  %v2200_v53 = vsel %vm267_vm3, %v2195_v29, 0  ;;  %v2739_v29 = vld [vmem:[%s4022_s5 + $0x1] ss:$0 sm:$0xff] }
0x17ce   :  { %3078 = vmatpush3.bf16.msra.mxu1 %v2200_v53 }
0x17cf   :  { %v3229_v7 = vpop.eup %3228  ;;  %3089 = vmatprep.subr.bf16.mxu1 %v3273_v10 }
0x17d0   :  { %v2181_v31 = vsel %vm142_vm2, %v3229_v7, 0.0 }
0x17d1   :  { %2182 = vadd.xlane.f32.xlu0 %v2181_v31 }
0x17d7   :  { %v3231_v33 = vpop.eup %3230 }
0x17d8   :  { %v2184_v28 = vsel %vm142_vm2, %v3231_v33, 0.0 }
0x17d9   :  { %2185 = vadd.xlane.f32.xlu0 %v2184_v28  ;;  %v3162_v28 = vld [vmem:[%s4025_s8 + $0x70] sm:$0xff]  }
0x17ef   :  { %2243 = vrot.lane.b32.xlu0 %v3842_v1, %s3275_s16 }
0x185e   :  { %v2183_v14 = vpop.xlane.xlu0 %2182 }
0x185f   :  { %3232 = vrcp.f32 %v2183_v14  ;;  %v3163_v14 = vld [vmem:[%s4025_s8 + $0x78] sm:$0xff]  }
0x1866   :  { %v2186_v2 = vpop.xlane.xlu0 %2185 }
0x1867   :  { %3234 = vrcp.f32 %v2186_v2  ;;  %v2745_v2 = vld [vmem:[%s4024_s7 + $0x1] ss:$0 sm:$0xff] }
0x1869   :  { %v3233_v11 = vpop.eup %3232 }
0x186a   :  { %v2189_v60 = vmul.f32 %v3233_v11, %v3229_v7  ;;  %v2244_v24 = vpop.permute.xlu0 %2243 }
0x186b   :  { %v2249_v36 = vsel %vm267_vm3, %v2244_v24, 0 }
0x186c   :  { %2729 = vst.msk [vmem:[%s4032_s15 + $0x58] sm:$0xff] %vm142_vm2, %v2189_v60  ;;  %3084 = vmatpush3.bf16.msra.mxu0 %v2249_v36  ;;  %v2191_v37 = vpack.c.bf16 %v2189_v60, %v2189_v60 }
0x186d   :  { %3097 = vmatprep.subr.bf16.mxu0 %v3273_v10 }
0x186e   :  { %3080 = vmatmul.mubr.msk.bf16.vlgmr.msra.gmra.mrb[80].mxu1 %vm142_vm2, %v2191_v37 }
0x186f   :  { %3093 = vmatprep.mubr.msk.bf16.mxu1 %vm3274_vm1, %v3273_v10 }
0x1871   :  { %v3235_v1 = vpop.eup %3234 }
0x1872   :  { %v2190_v38 = vmul.f32 %v3235_v1, %v3231_v33 }
0x1874   :  { %2733 = vst.msk [vmem:[%s4032_s15 + $0x78] sm:$0xff] %vm142_vm2, %v2190_v38  ;;  %v2192_v18 = vpack.c.bf16 %v2190_v38, %v2190_v38 }
0x1876   :  { %3086 = vmatmul.mubr.msk.bf16.vlgmr.msra.gmra.mrb[56].mxu0 %vm142_vm2, %v2192_v18 }
0x1877   :  { %3113 = vmatprep.mubr.msk.bf16.mxu0 %vm3274_vm1, %v3273_v10  ;;  %3098 = vmatpush3.bf16.msra.mxu0 %v3156_v30 }
0x1878   :  { %3099 = vmatprep.subr.bf16.mxu0 %v3273_v10 }
0x187b   :  { %3100 = vmatpush3.bf16.msra.mxu0 %v3157_v58 }
0x187c   :  { %3101 = vmatprep.subr.bf16.mxu0 %v3273_v10 }
0x187f   :  { %3102 = vmatpush3.bf16.msra.mxu0 %v3158_v61  ;;  %v2778_v61 = vld [vmem:[%s4028_s11 + $0x1] ss:$0 sm:$0xff] }
0x1880   :  { %3103 = vmatprep.subr.bf16.mxu0 %v3273_v10 }
0x1883   :  { %3104 = vmatpush3.bf16.msra.mxu0 %v3159_v6 }
0x1884   :  { %3105 = vmatprep.subr.bf16.mxu0 %v3273_v10 }
0x1887   :  { %3106 = vmatpush3.bf16.msra.mxu0 %v3160_v62 }
0x1888   :  { %3107 = vmatprep.subr.bf16.mxu0 %v3273_v10 }
0x188b   :  { %3108 = vmatpush3.bf16.msra.mxu0 %v3161_v34 }
0x188c   :  { %3109 = vmatprep.subr.bf16.mxu0 %v3273_v10 }
0x188f   :  { %3110 = vmatpush3.bf16.msra.mxu0 %v3162_v28 }
0x1890   :  { %3111 = vmatprep.subr.bf16.mxu0 %v3273_v10 }
0x1893   :  { %3112 = vmatpush3.bf16.msra.mxu0 %v3163_v14 }
0x1941   :  { %v2236_v39 = vpop.f32.mrb[80].mxu1 }
0x1942   :  { %v2291_v40 = vadd.f32 %v2236_v39, %v2067_v16  ;;  %v3081_v41 = vpop.f32.mrb[81].mxu1 }
0x1943   :  { %v2239_v42 = vpop.f32.mrb[82].mxu1 }
0x1944   :  { %v2302_v32 = vadd.f32 %v2291_v40, %v3702_v26  ;;  %v3082_v44 = vpop.f32.mrb[83].mxu1 }
0x1946   :  { %v2312_v21 = vadd.f32 %v2735_v43, %v2302_v32 }
0x1948   :  { %v2318_v46 = vsel %vm90_vm0, %v2312_v21, 0.0 }
0x1949   :  { %v2285_v47 = vpop.f32.mrb[56].mxu0  ;;  %2319 = vadd.xlane.f32.xlu1 %v2318_v46 }
0x194a   :  { %v2292_v48 = vadd.f32 %v2285_v47, %v3894_v20  ;;  %v3087_v49 = vpop.f32.mrb[57].mxu0  ;;  %v3155_v20 = vld [vmem:[%s4023_s6 + $0x18] sm:$0xff]  }
0x194b   :  { %v2288_v35 = vpop.f32.mrb[58].mxu0 }
0x194c   :  { %v2303_v50 = vadd.f32 %v2292_v48, %v3704_v0  ;;  %v3088_v51 = vpop.f32.mrb[59].mxu0  ;;  %v3154_v0 = vld [vmem:[%s4023_s6 + $0x10] sm:$0xff]   ;;  %s3248_s6 = scalar_lea.vmem %s2647_s29, 256 }
0x194d   :  { %3090 = vmatpush3.bf16.msra.mxu1 %v3154_v0  ;;  %p3249_p0 = scmp.ne.s32.totalorder %s2647_s29, %s3248_s6  ;;  %p3254_p2 = scmp.lt.s32.totalorder %s3248_s6, %s3248_s6 }
0x194e   :  { %v2313_v52 = vadd.f32 %v2735_v43, %v2303_v50  ;;  %3091 = vmatprep.subr.bf16.mxu1 %v3273_v10  ;;  %v2766_v10 = vld [vmem:[%s4026_s9 + $0x1] ss:$0 sm:$0xff] }
0x194f   :  { %p3255_p3 = por %p3254_p2, %p3253_p1 }
0x1950   :  { %v2321_v12 = vsel %vm90_vm0, %v2313_v52, 0.0 }
0x1951   :  { %2322 = vadd.xlane.f32.xlu0 %v2321_v12  ;;  %3092 = vmatpush3.bf16.msra.mxu1 %v3155_v20  ;;  %v2777_v20 = vld [vmem:[%s4027_s10 + $0x1] ss:$0 sm:$0xff]  ;;  %p3256_p4 = pnand %p3255_p3, %p3249_p0 }
0x19d6   :  { %v2320_v54 = vpop.xlane.xlu1 %2319 }
0x19d7   :  { %v2324_v55 = vmul.f32 0.03125, %v2320_v54 }
0x19d9   :  { %v2326_v26 = vsub.f32 %v2312_v21, %v2324_v55 }
0x19db   :  { %v2328_v5 = vmul.f32 %v2326_v26, %v2326_v26 }
0x19dd   :  { %v2330_v16 = vsel %vm90_vm0, %v2328_v5, 0.0 }
0x19de   :  { %v2323_v56 = vpop.xlane.xlu0 %2322  ;;  %2331 = vadd.xlane.f32.xlu1 %v2330_v16 }
0x19df   :  { %v2325_v57 = vmul.f32 0.03125, %v2323_v56 }
0x19e1   :  { %v2327_v9 = vsub.f32 %v2313_v52, %v2325_v57 }
0x19e3   :  { %v2329_v45 = vmul.f32 %v2327_v9, %v2327_v9 }
0x19e5   :  { %v2333_v59 = vsel %vm90_vm0, %v2329_v45, 0.0 }
0x19e6   :  { %2334 = vadd.xlane.f32.xlu0 %v2333_v59 }
0x1a6b   :  { %v2332_v3 = vpop.xlane.xlu1 %2331 }
0x1a6c   :  { %v2336_v4 = vmul.f32 0.03125, %v2332_v3 }
0x1a6e   :  { %v2338_v13 = vadd.f32 1e-05, %v2336_v4 }
0x1a70   :  { %3236 = vrsqrt.f32 %v2338_v13 }
0x1a73   :  { %v2335_v8 = vpop.xlane.xlu0 %2334 }
0x1a74   :  { %v2337_v63 = vmul.f32 0.03125, %v2335_v8 }
0x1a76   :  { %v2339_v15 = vadd.f32 1e-05, %v2337_v63 }
0x1a78   :  { %3238 = vrsqrt.f32 %v2339_v15 }
0x1a7a   :  { %v3237_v17 = vpop.eup %3236 }
0x1a7b   :  { %v2342_v19 = vmul.f32 %v3237_v17, %v2326_v26 }
0x1a7d   :  { %v2350_v25 = vmul.f32 %v2738_v22, %v2342_v19 }
0x1a7f   :  { %v2358_v7 = vadd.f32 %v2739_v29, %v2350_v25 }
0x1a82   :  { %v3239_v23 = vpop.eup %3238 }
0x1a83   :  { %v2343_v27 = vmul.f32 %v3239_v23, %v2327_v9 }
0x1a85   :  { %v2351_v53 = vmul.f32 %v2738_v22, %v2343_v27 }
0x1a87   :  { %v2359_v31 = vadd.f32 %v2739_v29, %v2351_v53 }
0x1a89   :  { %v2360_v33 = vpack.c.bf16 %v2359_v31, %v2358_v7 }
0x1a8b   :  { %3094 = vmatmul.mubr.msk.bf16.vlgmr.msra.gmra.mrb[84].mxu1 %vm90_vm0, %v2360_v33 }
0x1b5e   :  { %v2423_v11 = vpop.f32.mrb[84].mxu1 }
0x1b5f   :  { %v2424_v60 = vadd.f32 %v2745_v2, %v2423_v11  ;;  %v3095_v24 = vpop.f32.mrb[85].mxu1 }
0x1b60   :  { %v2426_v36 = vpop.f32.mrb[86].mxu1 }
0x1b61   :  { %v2427_v37 = vadd.f32 %v2745_v2, %v2426_v36  ;;  %v3096_v1 = vpop.f32.mrb[87].mxu1  ;;  %v2430_v38 = vmax.f32 %v2424_v60, 0.0  ;;  %v2779_v60 = vld [vmem:[%s4029_s12] ss:$0 sm:$0xff] }
0x1b63   :  { %v2431_v18 = vmax.f32 %v2427_v37, 0.0  ;;  %v2780_v37 = vld [vmem:[%s4030_s13] ss:$0 sm:$0xff] }
0x1b65   :  { %v2432_v39 = vpack.c.bf16 %v2431_v18, %v2430_v38 }
0x1b67   :  { %3114 = vmatmul.mubr.bf16.vlgmr.msra.gmra.mrb[60].mxu0 %v2432_v39 }
0x1c3a   :  { %v2540_v40 = vpop.f32.mrb[60].mxu0 }
0x1c3b   :  { %v2541_v41 = vadd.f32 %v2766_v10, %v2540_v40  ;;  %v3115_v42 = vpop.f32.mrb[61].mxu0 }
0x1c3c   :  { %v2543_v43 = vpop.f32.mrb[62].mxu0 }
0x1c3d   :  { %v2544_v32 = vadd.f32 %v2766_v10, %v2543_v43  ;;  %v3116_v44 = vpop.f32.mrb[63].mxu0  ;;  %v2547_v21 = vadd.f32 %v2541_v41, %v2358_v7 }
0x1c3f   :  { %v2553_v46 = vsel %vm90_vm0, %v2547_v21, 0.0  ;;  %v2548_v47 = vadd.f32 %v2544_v32, %v2359_v31 }
0x1c40   :  { %2554 = vadd.xlane.f32.xlu1 %v2553_v46 }
0x1c41   :  { %v2556_v48 = vsel %vm90_vm0, %v2548_v47, 0.0 }
0x1c42   :  { %2557 = vadd.xlane.f32.xlu0 %v2556_v48 }
0x1ccd   :  { %v2555_v49 = vpop.xlane.xlu1 %2554 }
0x1cce   :  { %v2559_v35 = vmul.f32 0.03125, %v2555_v49 }
0x1ccf   :  { %v2558_v50 = vpop.xlane.xlu0 %2557 }
0x1cd0   :  { %v2561_v51 = vsub.f32 %v2547_v21, %v2559_v35  ;;  %v2560_v52 = vmul.f32 0.03125, %v2558_v50 }
0x1cd2   :  { %v2562_v12 = vsub.f32 %v2548_v47, %v2560_v52  ;;  %v2563_v54 = vmul.f32 %v2561_v51, %v2561_v51 }
0x1cd4   :  { %v2565_v55 = vsel %vm90_vm0, %v2563_v54, 0.0  ;;  %v2564_v26 = vmul.f32 %v2562_v12, %v2562_v12 }
0x1cd5   :  { %2566 = vadd.xlane.f32.xlu1 %v2565_v55 }
0x1cd6   :  { %v2568_v5 = vsel %vm90_vm0, %v2564_v26, 0.0 }
0x1cd7   :  { %2569 = vadd.xlane.f32.xlu0 %v2568_v5 }
0x1d62   :  { %v2567_v16 = vpop.xlane.xlu1 %2566 }
0x1d63   :  { %v2571_v56 = vmul.f32 0.03125, %v2567_v16 }
0x1d64   :  { %v2570_v57 = vpop.xlane.xlu0 %2569 }
0x1d65   :  { %v2573_v9 = vadd.f32 1e-05, %v2571_v56  ;;  %v2572_v45 = vmul.f32 0.03125, %v2570_v57 }
0x1d67   :  { %3240 = vrsqrt.f32 %v2573_v9  ;;  %v2574_v59 = vadd.f32 1e-05, %v2572_v45 }
0x1d69   :  { %3242 = vrsqrt.f32 %v2574_v59 }
0x1d71   :  { %v3241_v0 = vpop.eup %3240 }
0x1d72   :  { %v2577_v30 = vmul.f32 %v3241_v0, %v2561_v51 }
0x1d73   :  { %v3243_v58 = vpop.eup %3242 }
0x1d74   :  { %v2585_v6 = vmul.f32 %v2777_v20, %v2577_v30  ;;  %v2578_v62 = vmul.f32 %v3243_v58, %v2562_v12 }
0x1d76   :  { %v2593_v34 = vadd.f32 %v2778_v61, %v2585_v6  ;;  %v2586_v3 = vmul.f32 %v2777_v20, %v2578_v62 }
0x1d78   :  { %v2597_v4 = vsel %vm90_vm0, %v2593_v34, 0.0  ;;  %v2594_v13 = vadd.f32 %v2778_v61, %v2586_v3 }
0x1d79   :  { %2598 = vadd.xlane.f32.xlu1 %v2597_v4 }
0x1d7a   :  { %v2600_v8 = vsel %vm90_vm0, %v2594_v13, 0.0 }
0x1d7b   :  { %2601 = vadd.xlane.f32.xlu0 %v2600_v8 }
0x1e06   :  { %v2599_v63 = vpop.xlane.xlu1 %2598 }
0x1e07   :  { %v2603_v15 = vmul.f32 0.03125, %v2599_v63 }
0x1e08   :  { %v2602_v17 = vpop.xlane.xlu0 %2601 }
0x1e09   :  { %v2605_v19 = vsub.f32 %v2593_v34, %v2603_v15  ;;  %v2604_v22 = vmul.f32 0.03125, %v2602_v17 }
0x1e0b   :  { %v2606_v23 = vsub.f32 %v2594_v13, %v2604_v22  ;;  %v2607_v25 = vmul.f32 %v2605_v19, %v2605_v19 }
0x1e0d   :  { %v2609_v27 = vsel %vm90_vm0, %v2607_v25, 0.0  ;;  %v2608_v29 = vmul.f32 %v2606_v23, %v2606_v23 }
0x1e0e   :  { %2610 = vadd.xlane.f32.xlu1 %v2609_v27 }
0x1e0f   :  { %v2612_v53 = vsel %vm90_vm0, %v2608_v29, 0.0 }
0x1e10   :  { %2613 = vadd.xlane.f32.xlu0 %v2612_v53 }
0x1e9b   :  { %v2611_v7 = vpop.xlane.xlu1 %2610 }
0x1e9c   :  { %v2615_v31 = vmul.f32 0.03125, %v2611_v7 }
0x1e9d   :  { %v2614_v33 = vpop.xlane.xlu0 %2613 }
0x1e9e   :  { %v2617_v28 = vadd.f32 1e-05, %v2615_v31  ;;  %v2616_v14 = vmul.f32 0.03125, %v2614_v33 }
0x1ea0   :  { %3244 = vrsqrt.f32 %v2617_v28  ;;  %v2618_v2 = vadd.f32 1e-05, %v2616_v14 }
0x1ea2   :  { %3246 = vrsqrt.f32 %v2618_v2 }
0x1eaa   :  { %v3245_v11 = vpop.eup %3244 }
0x1eab   :  { %v2621_v24 = vmul.f32 %v3245_v11, %v2605_v19 }
0x1eac   :  { %v3247_v36 = vpop.eup %3246 }
0x1ead   :  { %v2622_v1 = vmul.f32 %v3247_v36, %v2606_v23  ;;  %v2629_v38 = vmul.f32 %v2779_v60, %v2621_v24 }
0x1eaf   :  { %v2630_v18 = vmul.f32 %v2779_v60, %v2622_v1  ;;  %v2637_v39 = vadd.f32 %v2780_v37, %v2629_v38 }
0x1eb1   :  { %v2638_v10 = vadd.f32 %v2780_v37, %v2630_v18  ;;  %2639 = vst.msk [vmem:[#allocation2] sm:$0xff] %vm90_vm0, %v2637_v39 }
0x1eb3   :  { %2640 = vst.msk [vmem:[#allocation2 + $0x8] sm:$0xff] %vm90_vm0, %v2638_v10 }
0x1eb4   :  { %3259 = shalt.err (!%p3256_p4)
}
0x1eb5   :  { %s3260_s0 = scalar_lea.hbm %s4031_s14, 256 }
0x1eb6   :  { %p3261_p5 = scmp.ne.s32.totalorder %s4031_s14, %s3260_s0  ;;  %p3264_p6 = scmp.lt.u32.totalorder %s3260_s0, %s4031_s14 }
0x1eb8   :  { %p3266_p7 = pnand %p3264_p6, %p3261_p5 }
0x1eba   :  { %3269 = shalt.err (!%p3266_p7)
}
0x1ebb   :  { %s3285_s22 = smov 128   ;;  %s3286_s16 = smov 8  }
0x1ebc   :  { %2652 = dma.vmem_to_hbm [thread:$0]  %s2647_s29, 256, %s4031_s14, [#allocation3], %s3285_s22, %s3285_s22, %s3286_s16  }
0x1ebd   :  { %3270 = dma.done.wait [#allocation3], 256  }
0x1ebe   :  { %3271 = vsyncadd [#allocation3], 4294967040 }
0x1ebf   :  { %2660 = vsyncpa [#allocation3], 1 }

</bundles_post_ra>
